<compile_context>
chip_gen: v7x
topology: tpu7x:2x2x1
jax: 0.10.0
libtpu: 0.0.40
codegen_flags: <defaults>
</compile_context>

<pallas_src>
import jax
import jax.numpy as jnp
from jax import lax
from jax.experimental import pallas as pl
from jax.experimental.pallas import tpu as pltpu


def _tensorcores_per_device():
    """Best-effort TensorCore count behind one JAX device (megacore chips -> 2)."""
    try:
        info = pltpu.get_tpu_info()
        for name in ("tensorcores_per_chip", "num_tensorcores"):
            v = getattr(info, name, None)
            if isinstance(v, int) and v > 0:
                return v
    except Exception:
        pass
    try:
        kind = (getattr(jax.devices()[0], "device_kind", "") or "").lower()
    except Exception:
        kind = ""
    # Megacore-style chips: two TensorCores presented behind one device.
    if any(s in kind for s in ("v4", "v5p", "v7", "7x")):
        return 2
    return 1


def _pick_tiling(N, cores, max_nb=16):
    """Pick (Nb, grid, padded_N).

    Prefers the fewest grid steps (Nb as large as allowed) subject to
    grid % cores == 0, so single-TC chips get grid=1 and megacore chips get an
    even split.  If N has no suitable divisor, N is padded with zero images.
    """
    for nb in range(min(max_nb, N), 0, -1):
        if N % nb == 0 and (N // nb) % cores == 0:
            return nb, N // nb, N
    # No exact divisor: pad N up to grid * Nb with grid a multiple of `cores`.
    nb = min(max_nb, max(1, -(-N // cores)))
    grid = cores * (-(-N // (nb * cores)))
    return nb, grid, grid * nb


def _make_conv_kernel(H, W, Cin, Cout, KH, KW, padding, Nb):
    HW = H * W

    def conv_kernel(x_ref, w_ref, b_ref, o_ref):
        # x_ref: (Nb, Cin, Lpad) bf16 -- H-padded, (H,W)-flattened, end-padded, lane-padded
        # w_ref: (KH*KW, Cout, Cin) bf16 -- per-tap weight matrices, taps ordered (kh, kw)
        # b_ref: (Cout, 1) f32
        # o_ref: (Nb, Cout, HW) f32

        # ---- hoisted: output-column index (j = flat % W) and per-kw wrap masks
        wcol = lax.broadcasted_iota(jnp.int32, (1, 1, HW), 2) % W
        masks = []
        for kw in range(KW):
            lo = padding - kw
            hi = W + padding - kw
            if lo > 0 and hi < W:
                m = (wcol >= lo) & (wcol < hi)
            elif lo > 0:
                m = wcol >= lo
            elif hi < W:
                m = wcol < hi
            else:
                m = None
            masks.append(m)

        # ---- per-tap batched matmuls, accumulated in registers (no scratch slab)
        acc = None
        for kh in range(KH):
            for kw in range(KW):
                t = kh * KW + kw
                start = kh * W + kw                         # static lane shift
                tap = x_ref[:, :, start:start + HW]         # (Nb, Cin, HW) bf16
                w_t = jnp.broadcast_to(w_ref[t], (Nb, Cout, Cin))
                contrib = jnp.einsum("noc,nch->noh", w_t, tap,
                                     preferred_element_type=jnp.float32)
                m = masks[kw]
                if m is not None:
                    # zero the output columns whose sample wrapped across the
                    # W boundary (mask in f32, post-matmul: no bf16 selects)
                    contrib = jnp.where(m, contrib, 0.0)
                acc = contrib if acc is None else acc + contrib

        # ---- bias add + one lane-dense store of the whole block
        o_ref[...] = (acc + b_ref[...][None, :, :]).astype(o_ref.dtype)

    return conv_kernel


def conv2d_ext_pallas(x_btchw, weight_oihw, bias_o, *, padding=1,
                      operand_dtype=jnp.bfloat16, max_nb=16):
    """Forward pass of Conv2DExt (stride=1, 'same' conv).

    x_btchw:     (B, T, Cin, H, W)   float32
    weight_oihw: (Cout, Cin, KH, KW) float32  (PyTorch layout)
    bias_o:      (Cout,)             float32
    returns:     (B, T, Cout, H, W)  float32
    """
    B, T, Cin, H, W = x_btchw.shape
    Cout, Cin_w, KH, KW = weight_oihw.shape
    assert Cin == Cin_w
    assert KH == 2 * padding + 1 and KW == 2 * padding + 1, "same-size conv only"
    N = B * T
    HW = H * W

    # ---- glue (no transposes): merge (B,T), cast, H-pad, flatten, end-pad
    x = x_btchw.reshape(N, Cin, H, W).astype(operand_dtype)
    xp = jnp.pad(x, ((0, 0), (0, 0), (padding, padding), (0, 0)))   # pad H only
    xf = xp.reshape(N, Cin, (H + 2 * padding) * W)
    xf = jnp.pad(xf, ((0, 0), (0, 0), (padding, padding)))          # flat end pads
    L = xf.shape[-1]
    Lpad = ((L + 127) // 128) * 128                                  # full-vreg rows
    if Lpad != L:
        xf = jnp.pad(xf, ((0, 0), (0, 0), (0, Lpad - L)))

    # weight -> (KH*KW, Cout, Cin), taps ordered (kh, kw); bias -> (Cout, 1) f32
    w_taps = jnp.transpose(weight_oihw, (2, 3, 0, 1)).reshape(KH * KW, Cout, Cin)
    w_taps = w_taps.astype(operand_dtype)
    b_col = bias_o.reshape(Cout, 1).astype(jnp.float32)

    # ---- generation-aware tiling
    cores = _tensorcores_per_device()
    Nb, grid, Np = _pick_tiling(N, cores, max_nb=max_nb)
    if Np != N:
        xf = jnp.pad(xf, ((0, Np - N), (0, 0), (0, 0)))   # zero images, sliced off below

    kernel = _make_conv_kernel(H, W, Cin, Cout, KH, KW, padding, Nb)

    out = pl.pallas_call(
        kernel,
        out_shape=jax.ShapeDtypeStruct((Np, Cout, HW), jnp.float32),
        grid_spec=pltpu.PrefetchScalarGridSpec(
            num_scalar_prefetch=0,
            grid=(grid,),
            in_specs=[
                pl.BlockSpec((Nb, Cin, Lpad), lambda i: (i, 0, 0)),
                pl.BlockSpec((KH * KW, Cout, Cin), lambda i: (0, 0, 0)),  # resident weight
                pl.BlockSpec((Cout, 1), lambda i: (0, 0)),                # resident bias
            ],
            out_specs=pl.BlockSpec((Nb, Cout, HW), lambda i: (i, 0, 0)),
        ),
        compiler_params=pltpu.CompilerParams(
            dimension_semantics=("parallel",)),
    )(xf, w_taps, b_col)

    # free metadata reshapes: (N, Cout, H*W) -> (B, T, Cout, H, W)
    return out[:N].reshape(B, T, Cout, H, W)


if __name__ == "__main__":
    B, T, Cin, H, W = 2, 3, 4, 16, 16
    Cout, KH, KW = 8, 3, 3
    padding = 1

    key = jax.random.PRNGKey(0)
    kx, kw_, kb = jax.random.split(key, 3)
    x = jax.random.normal(kx, (B, T, Cin, H, W), dtype=jnp.float32)
    # PyTorch-Conv2d-like uniform init bound
    fan_in = Cin * KH * KW
    bound = 1.0 / (fan_in ** 0.5)
    weight = jax.random.uniform(kw_, (Cout, Cin, KH, KW),
                                minval=-bound, maxval=bound, dtype=jnp.float32)
    bias = jax.random.uniform(kb, (Cout,), minval=-bound, maxval=bound,
                              dtype=jnp.float32)

    y = conv2d_ext_pallas(x, weight, bias, padding=padding)
    y = jax.block_until_ready(y)
    assert y.shape == (B, T, Cout, H, W)

    # reference: f32 lax conv (NCHW / OIHW); kernel uses bf16 operands + f32 acc,
    # so tolerance is relaxed slightly.
    x_flat = x.reshape(B * T, Cin, H, W)
    ref = lax.conv_general_dilated(
        x_flat, weight, window_strides=(1, 1),
        padding=((padding, padding), (padding, padding)),
        dimension_numbers=("NCHW", "OIHW", "NCHW"))
    ref = ref + bias.reshape(1, Cout, 1, 1)
    ref = ref.reshape(B, T, Cout, H, W)
    assert jnp.allclose(y, ref, atol=2e-2, rtol=2e-2), "mismatch vs lax.conv reference"

    print("KERNEL_OK")
</pallas_src>

<mosaic_0001>
module attributes {stable_mosaic.version = 11 : i64} {
  func.func @conv_kernel(%arg0: i32, %arg1: memref<6x4x384xbf16, #tpu.memory_space<vmem>>, %arg2: memref<9x8x4xbf16, #tpu.memory_space<vmem>>, %arg3: memref<8x1xf32, #tpu.memory_space<vmem>>, %arg4: memref<6x8x256xf32, #tpu.memory_space<vmem>>) attributes {dimension_semantics = [#tpu.dimension_semantics<parallel>], iteration_bounds = array<i64: 1>, scalar_prefetch = 0 : i64, scratch_operands = 0 : i64, tpu.core_type = #tpu.core_type<tc>, window_params = [{transform_indices = @transform_0, window_bounds = array<i64: 6, 4, 384>}, {pipeline_mode = #tpu.pipeline_mode<synchronous>, transform_indices = @transform_1, window_bounds = array<i64: 9, 8, 4>}, {pipeline_mode = #tpu.pipeline_mode<synchronous>, transform_indices = @transform_2, window_bounds = array<i64: 8, 1>}, {transform_indices = @transform_3, window_bounds = array<i64: 6, 8, 256>}]} {
    %0 = tpu.iota {dimensions = array<i32: 2>} : vector<1x1x256xi32>
    %c16_i32 = arith.constant 16 : i32
    %c0_i32 = arith.constant 0 : i32
    %1 = arith.cmpi eq, %c16_i32, %c0_i32 : i32
    %c1_i32 = arith.constant 1 : i32
    %2 = arith.select %1, %c1_i32, %c16_i32 : i32
    %3 = vector.broadcast %2 : i32 to vector<1x1x256xi32>
    %4 = arith.remsi %0, %3 : vector<1x1x256xi32>
    %c0_i32_0 = arith.constant 0 : i32
    %5 = vector.broadcast %c0_i32_0 : i32 to vector<1x1x256xi32>
    %6 = arith.cmpi ne, %4, %5 : vector<1x1x256xi32>
    %c0_i32_1 = arith.constant 0 : i32
    %7 = vector.broadcast %c0_i32_1 : i32 to vector<1x1x256xi32>
    %8 = arith.cmpi slt, %4, %7 : vector<1x1x256xi32>
    %c0_i32_2 = arith.constant 0 : i32
    %9 = arith.cmpi slt, %2, %c0_i32_2 : i32
    %10 = vector.broadcast %9 : i1 to vector<1x1x256xi1>
    %11 = vector.broadcast %10 : vector<1x1x256xi1> to vector<1x1x256xi1>
    %12 = arith.xori %8, %11 : vector<1x1x256xi1>
    %13 = arith.andi %12, %6 : vector<1x1x256xi1>
    %14 = vector.broadcast %2 : i32 to vector<1x1x256xi32>
    %15 = arith.addi %4, %14 : vector<1x1x256xi32>
    %16 = arith.select %13, %15, %4 : vector<1x1x256xi1>, vector<1x1x256xi32>
    %c1_i32_3 = arith.constant 1 : i32
    %17 = vector.broadcast %c1_i32_3 : i32 to vector<1x1x256xi32>
    %18 = arith.cmpi sge, %16, %17 : vector<1x1x256xi32>
    %c15_i32 = arith.constant 15 : i32
    %19 = vector.broadcast %c15_i32 : i32 to vector<1x1x256xi32>
    %20 = arith.cmpi slt, %16, %19 : vector<1x1x256xi32>
    %c0 = arith.constant 0 : index
    %c0_4 = arith.constant 0 : index
    %c0_5 = arith.constant 0 : index
    %21 = vector.load %arg1[%c0, %c0_4, %c0_5] : memref<6x4x384xbf16, #tpu.memory_space<vmem>>, vector<6x4x256xbf16>
    %c0_6 = arith.constant 0 : index
    %c0_7 = arith.constant 0 : index
    %c0_8 = arith.constant 0 : index
    %22 = vector.load %arg2[%c0_6, %c0_7, %c0_8] : memref<9x8x4xbf16, #tpu.memory_space<vmem>>, vector<1x8x4xbf16>
    %23 = vector.shape_cast %22 : vector<1x8x4xbf16> to vector<8x4xbf16>
    %24 = vector.shape_cast %23 : vector<8x4xbf16> to vector<1x8x4xbf16>
    %25 = vector.broadcast %24 : vector<1x8x4xbf16> to vector<6x8x4xbf16>
    "tpu.trace_start"() <{level = 10 : i32, message = "noc,nch->noh"}> : () -> ()
    %cst = arith.constant dense<0.000000e+00> : vector<6x8x256xf32>
    %26 = tpu.matmul %25, %21, %cst {dimension_numbers = #tpu.dot_dimension_numbers<[2], [1], [1], [2], [0, 0, 0, 1, 1, 2], [0], [0]>} : vector<6x8x4xbf16>, vector<6x4x256xbf16>, vector<6x8x256xf32> -> vector<6x8x256xf32>
    %cst_9 = arith.constant 0.000000e+00 : f32
    "tpu.trace_stop"() : () -> ()
    %27 = vector.shape_cast %18 : vector<1x1x256xi1> to vector<1x1x256xi1>
    %28 = vector.broadcast %27 : vector<1x1x256xi1> to vector<6x8x256xi1>
    %29 = vector.broadcast %cst_9 : f32 to vector<6x8x256xf32>
    %30 = arith.select %28, %26, %29 : vector<6x8x256xi1>, vector<6x8x256xf32>
    %c0_10 = arith.constant 0 : index
    %c0_11 = arith.constant 0 : index
    %c1 = arith.constant 1 : index
    %31 = vector.load %arg1[%c0_10, %c0_11, %c1] : memref<6x4x384xbf16, #tpu.memory_space<vmem>>, vector<6x4x256xbf16>
    %c1_12 = arith.constant 1 : index
    %c0_13 = arith.constant 0 : index
    %c0_14 = arith.constant 0 : index
    %32 = vector.load %arg2[%c1_12, %c0_13, %c0_14] : memref<9x8x4xbf16, #tpu.memory_space<vmem>>, vector<1x8x4xbf16>
    %33 = vector.shape_cast %32 : vector<1x8x4xbf16> to vector<8x4xbf16>
    %34 = vector.shape_cast %33 : vector<8x4xbf16> to vector<1x8x4xbf16>
    %35 = vector.broadcast %34 : vector<1x8x4xbf16> to vector<6x8x4xbf16>
    "tpu.trace_start"() <{level = 10 : i32, message = "noc,nch->noh"}> : () -> ()
    %cst_15 = arith.constant dense<0.000000e+00> : vector<6x8x256xf32>
    %36 = tpu.matmul %35, %31, %cst_15 {dimension_numbers = #tpu.dot_dimension_numbers<[2], [1], [1], [2], [0, 0, 0, 1, 1, 2], [0], [0]>} : vector<6x8x4xbf16>, vector<6x4x256xbf16>, vector<6x8x256xf32> -> vector<6x8x256xf32>
    "tpu.trace_stop"() : () -> ()
    %37 = arith.addf %30, %36 : vector<6x8x256xf32>
    %c0_16 = arith.constant 0 : index
    %c0_17 = arith.constant 0 : index
    %c2 = arith.constant 2 : index
    %38 = vector.load %arg1[%c0_16, %c0_17, %c2] : memref<6x4x384xbf16, #tpu.memory_space<vmem>>, vector<6x4x256xbf16>
    %c2_18 = arith.constant 2 : index
    %c0_19 = arith.constant 0 : index
    %c0_20 = arith.constant 0 : index
    %39 = vector.load %arg2[%c2_18, %c0_19, %c0_20] : memref<9x8x4xbf16, #tpu.memory_space<vmem>>, vector<1x8x4xbf16>
    %40 = vector.shape_cast %39 : vector<1x8x4xbf16> to vector<8x4xbf16>
    %41 = vector.shape_cast %40 : vector<8x4xbf16> to vector<1x8x4xbf16>
    %42 = vector.broadcast %41 : vector<1x8x4xbf16> to vector<6x8x4xbf16>
    "tpu.trace_start"() <{level = 10 : i32, message = "noc,nch->noh"}> : () -> ()
    %cst_21 = arith.constant dense<0.000000e+00> : vector<6x8x256xf32>
    %43 = tpu.matmul %42, %38, %cst_21 {dimension_numbers = #tpu.dot_dimension_numbers<[2], [1], [1], [2], [0, 0, 0, 1, 1, 2], [0], [0]>} : vector<6x8x4xbf16>, vector<6x4x256xbf16>, vector<6x8x256xf32> -> vector<6x8x256xf32>
    %cst_22 = arith.constant 0.000000e+00 : f32
    "tpu.trace_stop"() : () -> ()
    %44 = vector.shape_cast %20 : vector<1x1x256xi1> to vector<1x1x256xi1>
    %45 = vector.broadcast %44 : vector<1x1x256xi1> to vector<6x8x256xi1>
    %46 = vector.broadcast %cst_22 : f32 to vector<6x8x256xf32>
    %47 = arith.select %45, %43, %46 : vector<6x8x256xi1>, vector<6x8x256xf32>
    %48 = arith.addf %37, %47 : vector<6x8x256xf32>
    %c0_23 = arith.constant 0 : index
    %c0_24 = arith.constant 0 : index
    %c16 = arith.constant 16 : index
    %49 = vector.load %arg1[%c0_23, %c0_24, %c16] : memref<6x4x384xbf16, #tpu.memory_space<vmem>>, vector<6x4x256xbf16>
    %c3 = arith.constant 3 : index
    %c0_25 = arith.constant 0 : index
    %c0_26 = arith.constant 0 : index
    %50 = vector.load %arg2[%c3, %c0_25, %c0_26] : memref<9x8x4xbf16, #tpu.memory_space<vmem>>, vector<1x8x4xbf16>
    %51 = vector.shape_cast %50 : vector<1x8x4xbf16> to vector<8x4xbf16>
    %52 = vector.shape_cast %51 : vector<8x4xbf16> to vector<1x8x4xbf16>
    %53 = vector.broadcast %52 : vector<1x8x4xbf16> to vector<6x8x4xbf16>
    "tpu.trace_start"() <{level = 10 : i32, message = "noc,nch->noh"}> : () -> ()
    %cst_27 = arith.constant dense<0.000000e+00> : vector<6x8x256xf32>
    %54 = tpu.matmul %53, %49, %cst_27 {dimension_numbers = #tpu.dot_dimension_numbers<[2], [1], [1], [2], [0, 0, 0, 1, 1, 2], [0], [0]>} : vector<6x8x4xbf16>, vector<6x4x256xbf16>, vector<6x8x256xf32> -> vector<6x8x256xf32>
    %cst_28 = arith.constant 0.000000e+00 : f32
    "tpu.trace_stop"() : () -> ()
    %55 = vector.shape_cast %18 : vector<1x1x256xi1> to vector<1x1x256xi1>
    %56 = vector.broadcast %55 : vector<1x1x256xi1> to vector<6x8x256xi1>
    %57 = vector.broadcast %cst_28 : f32 to vector<6x8x256xf32>
    %58 = arith.select %56, %54, %57 : vector<6x8x256xi1>, vector<6x8x256xf32>
    %59 = arith.addf %48, %58 : vector<6x8x256xf32>
    %c0_29 = arith.constant 0 : index
    %c0_30 = arith.constant 0 : index
    %c17 = arith.constant 17 : index
    %60 = vector.load %arg1[%c0_29, %c0_30, %c17] : memref<6x4x384xbf16, #tpu.memory_space<vmem>>, vector<6x4x256xbf16>
    %c4 = arith.constant 4 : index
    %c0_31 = arith.constant 0 : index
    %c0_32 = arith.constant 0 : index
    %61 = vector.load %arg2[%c4, %c0_31, %c0_32] : memref<9x8x4xbf16, #tpu.memory_space<vmem>>, vector<1x8x4xbf16>
    %62 = vector.shape_cast %61 : vector<1x8x4xbf16> to vector<8x4xbf16>
    %63 = vector.shape_cast %62 : vector<8x4xbf16> to vector<1x8x4xbf16>
    %64 = vector.broadcast %63 : vector<1x8x4xbf16> to vector<6x8x4xbf16>
    "tpu.trace_start"() <{level = 10 : i32, message = "noc,nch->noh"}> : () -> ()
    %cst_33 = arith.constant dense<0.000000e+00> : vector<6x8x256xf32>
    %65 = tpu.matmul %64, %60, %cst_33 {dimension_numbers = #tpu.dot_dimension_numbers<[2], [1], [1], [2], [0, 0, 0, 1, 1, 2], [0], [0]>} : vector<6x8x4xbf16>, vector<6x4x256xbf16>, vector<6x8x256xf32> -> vector<6x8x256xf32>
    "tpu.trace_stop"() : () -> ()
    %66 = arith.addf %59, %65 : vector<6x8x256xf32>
    %c0_34 = arith.constant 0 : index
    %c0_35 = arith.constant 0 : index
    %c18 = arith.constant 18 : index
    %67 = vector.load %arg1[%c0_34, %c0_35, %c18] : memref<6x4x384xbf16, #tpu.memory_space<vmem>>, vector<6x4x256xbf16>
    %c5 = arith.constant 5 : index
    %c0_36 = arith.constant 0 : index
    %c0_37 = arith.constant 0 : index
    %68 = vector.load %arg2[%c5, %c0_36, %c0_37] : memref<9x8x4xbf16, #tpu.memory_space<vmem>>, vector<1x8x4xbf16>
    %69 = vector.shape_cast %68 : vector<1x8x4xbf16> to vector<8x4xbf16>
    %70 = vector.shape_cast %69 : vector<8x4xbf16> to vector<1x8x4xbf16>
    %71 = vector.broadcast %70 : vector<1x8x4xbf16> to vector<6x8x4xbf16>
    "tpu.trace_start"() <{level = 10 : i32, message = "noc,nch->noh"}> : () -> ()
    %cst_38 = arith.constant dense<0.000000e+00> : vector<6x8x256xf32>
    %72 = tpu.matmul %71, %67, %cst_38 {dimension_numbers = #tpu.dot_dimension_numbers<[2], [1], [1], [2], [0, 0, 0, 1, 1, 2], [0], [0]>} : vector<6x8x4xbf16>, vector<6x4x256xbf16>, vector<6x8x256xf32> -> vector<6x8x256xf32>
    %cst_39 = arith.constant 0.000000e+00 : f32
    "tpu.trace_stop"() : () -> ()
    %73 = vector.shape_cast %20 : vector<1x1x256xi1> to vector<1x1x256xi1>
    %74 = vector.broadcast %73 : vector<1x1x256xi1> to vector<6x8x256xi1>
    %75 = vector.broadcast %cst_39 : f32 to vector<6x8x256xf32>
    %76 = arith.select %74, %72, %75 : vector<6x8x256xi1>, vector<6x8x256xf32>
    %77 = arith.addf %66, %76 : vector<6x8x256xf32>
    %c0_40 = arith.constant 0 : index
    %c0_41 = arith.constant 0 : index
    %c32 = arith.constant 32 : index
    %78 = vector.load %arg1[%c0_40, %c0_41, %c32] : memref<6x4x384xbf16, #tpu.memory_space<vmem>>, vector<6x4x256xbf16>
    %c6 = arith.constant 6 : index
    %c0_42 = arith.constant 0 : index
    %c0_43 = arith.constant 0 : index
    %79 = vector.load %arg2[%c6, %c0_42, %c0_43] : memref<9x8x4xbf16, #tpu.memory_space<vmem>>, vector<1x8x4xbf16>
    %80 = vector.shape_cast %79 : vector<1x8x4xbf16> to vector<8x4xbf16>
    %81 = vector.shape_cast %80 : vector<8x4xbf16> to vector<1x8x4xbf16>
    %82 = vector.broadcast %81 : vector<1x8x4xbf16> to vector<6x8x4xbf16>
    "tpu.trace_start"() <{level = 10 : i32, message = "noc,nch->noh"}> : () -> ()
    %cst_44 = arith.constant dense<0.000000e+00> : vector<6x8x256xf32>
    %83 = tpu.matmul %82, %78, %cst_44 {dimension_numbers = #tpu.dot_dimension_numbers<[2], [1], [1], [2], [0, 0, 0, 1, 1, 2], [0], [0]>} : vector<6x8x4xbf16>, vector<6x4x256xbf16>, vector<6x8x256xf32> -> vector<6x8x256xf32>
    %cst_45 = arith.constant 0.000000e+00 : f32
    "tpu.trace_stop"() : () -> ()
    %84 = vector.shape_cast %18 : vector<1x1x256xi1> to vector<1x1x256xi1>
    %85 = vector.broadcast %84 : vector<1x1x256xi1> to vector<6x8x256xi1>
    %86 = vector.broadcast %cst_45 : f32 to vector<6x8x256xf32>
    %87 = arith.select %85, %83, %86 : vector<6x8x256xi1>, vector<6x8x256xf32>
    %88 = arith.addf %77, %87 : vector<6x8x256xf32>
    %c0_46 = arith.constant 0 : index
    %c0_47 = arith.constant 0 : index
    %c33 = arith.constant 33 : index
    %89 = vector.load %arg1[%c0_46, %c0_47, %c33] : memref<6x4x384xbf16, #tpu.memory_space<vmem>>, vector<6x4x256xbf16>
    %c7 = arith.constant 7 : index
    %c0_48 = arith.constant 0 : index
    %c0_49 = arith.constant 0 : index
    %90 = vector.load %arg2[%c7, %c0_48, %c0_49] : memref<9x8x4xbf16, #tpu.memory_space<vmem>>, vector<1x8x4xbf16>
    %91 = vector.shape_cast %90 : vector<1x8x4xbf16> to vector<8x4xbf16>
    %92 = vector.shape_cast %91 : vector<8x4xbf16> to vector<1x8x4xbf16>
    %93 = vector.broadcast %92 : vector<1x8x4xbf16> to vector<6x8x4xbf16>
    "tpu.trace_start"() <{level = 10 : i32, message = "noc,nch->noh"}> : () -> ()
    %cst_50 = arith.constant dense<0.000000e+00> : vector<6x8x256xf32>
    %94 = tpu.matmul %93, %89, %cst_50 {dimension_numbers = #tpu.dot_dimension_numbers<[2], [1], [1], [2], [0, 0, 0, 1, 1, 2], [0], [0]>} : vector<6x8x4xbf16>, vector<6x4x256xbf16>, vector<6x8x256xf32> -> vector<6x8x256xf32>
    "tpu.trace_stop"() : () -> ()
    %95 = arith.addf %88, %94 : vector<6x8x256xf32>
    %c0_51 = arith.constant 0 : index
    %c0_52 = arith.constant 0 : index
    %c34 = arith.constant 34 : index
    %96 = vector.load %arg1[%c0_51, %c0_52, %c34] : memref<6x4x384xbf16, #tpu.memory_space<vmem>>, vector<6x4x256xbf16>
    %c8 = arith.constant 8 : index
    %c0_53 = arith.constant 0 : index
    %c0_54 = arith.constant 0 : index
    %97 = vector.load %arg2[%c8, %c0_53, %c0_54] : memref<9x8x4xbf16, #tpu.memory_space<vmem>>, vector<1x8x4xbf16>
    %98 = vector.shape_cast %97 : vector<1x8x4xbf16> to vector<8x4xbf16>
    %99 = vector.shape_cast %98 : vector<8x4xbf16> to vector<1x8x4xbf16>
    %100 = vector.broadcast %99 : vector<1x8x4xbf16> to vector<6x8x4xbf16>
    "tpu.trace_start"() <{level = 10 : i32, message = "noc,nch->noh"}> : () -> ()
    %cst_55 = arith.constant dense<0.000000e+00> : vector<6x8x256xf32>
    %101 = tpu.matmul %100, %96, %cst_55 {dimension_numbers = #tpu.dot_dimension_numbers<[2], [1], [1], [2], [0, 0, 0, 1, 1, 2], [0], [0]>} : vector<6x8x4xbf16>, vector<6x4x256xbf16>, vector<6x8x256xf32> -> vector<6x8x256xf32>
    %cst_56 = arith.constant 0.000000e+00 : f32
    "tpu.trace_stop"() : () -> ()
    %102 = vector.shape_cast %20 : vector<1x1x256xi1> to vector<1x1x256xi1>
    %103 = vector.broadcast %102 : vector<1x1x256xi1> to vector<6x8x256xi1>
    %104 = vector.broadcast %cst_56 : f32 to vector<6x8x256xf32>
    %105 = arith.select %103, %101, %104 : vector<6x8x256xi1>, vector<6x8x256xf32>
    %106 = arith.addf %95, %105 : vector<6x8x256xf32>
    %c0_57 = arith.constant 0 : index
    %c0_58 = arith.constant 0 : index
    %107 = vector.load %arg3[%c0_57, %c0_58] : memref<8x1xf32, #tpu.memory_space<vmem>>, vector<8x1xf32>
    %108 = vector.shape_cast %107 : vector<8x1xf32> to vector<1x8x1xf32>
    %109 = vector.broadcast %108 : vector<1x8x1xf32> to vector<6x8x256xf32>
    %110 = arith.addf %106, %109 : vector<6x8x256xf32>
    %c0_59 = arith.constant 0 : index
    %c0_60 = arith.constant 0 : index
    %c0_61 = arith.constant 0 : index
    %111 = vector.load %arg4[%c0_59, %c0_60, %c0_61] : memref<6x8x256xf32, #tpu.memory_space<vmem>>, vector<6x8x256xf32>
    tpu.vector_store %arg4[%c0_59, %c0_60, %c0_61], %110 {strides = array<i32>} : memref<6x8x256xf32, #tpu.memory_space<vmem>>, vector<6x8x256xf32>,
    return
  }
  func.func @transform_0(%arg0: i32) -> (i32, i32, i32) {
    %c0_i32 = arith.constant 0 : i32
    %c0_i32_0 = arith.constant 0 : i32
    %c0_i32_1 = arith.constant 0 : i32
    return %arg0, %c0_i32, %c0_i32_0 : i32, i32, i32
  }
  func.func @transform_1(%arg0: i32) -> (i32, i32, i32) {
    %c0_i32 = arith.constant 0 : i32
    %c0_i32_0 = arith.constant 0 : i32
    %c0_i32_1 = arith.constant 0 : i32
    %c0_i32_2 = arith.constant 0 : i32
    return %c0_i32, %c0_i32_0, %c0_i32_1 : i32, i32, i32
  }
  func.func @transform_2(%arg0: i32) -> (i32, i32) {
    %c0_i32 = arith.constant 0 : i32
    %c0_i32_0 = arith.constant 0 : i32
    %c0_i32_1 = arith.constant 0 : i32
    return %c0_i32, %c0_i32_0 : i32, i32
  }
  func.func @transform_3(%arg0: i32) -> (i32, i32, i32) {
    %c0_i32 = arith.constant 0 : i32
    %c0_i32_0 = arith.constant 0 : i32
    %c0_i32_1 = arith.constant 0 : i32
    return %arg0, %c0_i32, %c0_i32_0 : i32, i32, i32
  }
}

</mosaic_0001>

<bundles_post_ra>
// kernel: tpu_custom_call.1
= control target key start
LH: loop header
LB: loop body
LE: loop exit
PB: predicated region body
PF: predicated region fallthrough
CT: control target
= control target key end

     0   :  { %v16_v0 = vlaneseq  ;;  %v4377_v2 = vmov 1983009808   ;;  %s4378_s16 = smov 127   ;;  %s5532_s0 = inlined_call_operand.vmem [shape: bf16[6,4,384], index: 0, kind: input, shape index: {}]   ;;  %s5533_s1 = inlined_call_operand.vmem [shape: bf16[9,8,4], index: 1, kind: input, shape index: {}]   ;;  %s5534_s2 = inlined_call_operand.vmem [shape: f32[8,1], index: 2, kind: input, shape index: {}]   ;;  %s5535_s3 = inlined_call_operand.hbm [shape: f32[6,8,256], index: 3, kind: output, shape index: {}]  }
   0x1   :  { %v411_v1 = vld [vmem:[%s5532_s0] sm:$0x3f]  ;;  %v422_v3 = vunpack.c.l.s4 %v4377_v2  ;;  %v412_v8 = vld [vmem:[%s5532_s0 + $0x6] sm:$0x3f]  ;;  %v413_v14 = vld [vmem:[%s5532_s0 + $0xc] sm:$0x3f] }
   0x2   :  { %v425_v4 = vshrl.u32 %v16_v0, 7  ;;  %v420_v5 = vcombine.high %v411_v1, %v411_v1  ;;  %v496_v13 = vcombine.high %v412_v8, %v412_v8 }
   0x3   :  { %v423_v6 = vunpack.c.0.s8 %v422_v3 }
   0x5   :  { %v4414_v7 = vsub.s32 %v423_v6, %v425_v4 }
   0x7   :  { %v434_v9 = vrot.slane %v420_v5, %v4414_v7  ;;  %v427_v10 = vrot.slane %v411_v1, %v4414_v7  ;;  %v503_v12 = vrot.slane %v412_v8, %v4414_v7  ;;  %v510_v15 = vrot.slane %v496_v13, %v4414_v7 }
   0x8   :  { %v575_v17 = vrot.slane %v413_v14, %v4414_v7 }
   0x9   :  { %440 = vrot.lane.b32.xlu1 %v434_v9, %s4378_s16  ;;  %436 = vrot.lane.b32.xlu0 %v427_v10, %s4378_s16  ;;  %v435_v11 = vcombine.high %v427_v10, %v427_v10  ;;  %v511_v16 = vcombine.high %v503_v12, %v503_v12 }
   0xd   :  { %512 = vrot.lane.b32.xlu1 %v503_v12, %s4378_s16  ;;  %438 = vrot.lane.b32.xlu0 %v435_v11, %s4378_s16 }
   0xe   :  { %8 = vsyncpa [#allocation3], 0  ;;  %v583_v18 = vcombine.high %v575_v17, %v575_v17  ;;  %v568_v19 = vcombine.high %v413_v14, %v413_v14  ;;  %v4169_v20 = vld.sshfl [vmem:[%s5532_s0] sm:$0x33 pattern:$0x76325410] }
   0xf   :  { %vm67_vm0 = vcmask 1041408   ;;  %v414_v21 = vld [vmem:[%s5532_s0 + $0x12] sm:$0x3f]  ;;  %v4379_v22 = vmov 0   ;;  %v62_v24 = vcombine.high %v4169_v20, %v4169_v20  ;;  %v415_v31 = vld [vmem:[%s5532_s0 + $0x18] sm:$0x3f] }
  0x10   :  { %106 = vmatprep.mubr.bf16.mxu0 %v4379_v22  ;;  %v4172_v23 = vld.sshfl [vmem:[%s5532_s0 + $0x6] sm:$0x33 pattern:$0x76325410]  ;;  %162 = vmatprep.mubr.bf16.mxu1 %v4379_v22  ;;  %v69_v25 = vsel %vm67_vm0, %v4169_v20, 0  ;;  %v647_v27 = vrot.slane %v414_v21, %v4414_v7  ;;  %v582_v28 = vrot.slane %v568_v19, %v4414_v7  ;;  %v640_v29 = vcombine.high %v414_v21, %v414_v21  ;;  %s4380_s17 = smov 126  }
  0x11   :  { %516 = vrot.lane.b32.xlu1 %v510_v15, %s4378_s16  ;;  %514 = vrot.lane.b32.xlu0 %v511_v16, %s4378_s16  ;;  %v4175_v26 = vld.sshfl [vmem:[%s5532_s0 + $0xc] sm:$0x33 pattern:$0x76325410]  ;;  %v4463_v32 = vld [vmem:[%s5533_s1] sm:$0xf]  ;;  %v123_v33 = vcombine.high %v4172_v23, %v4172_v23  ;;  %v719_v40 = vrot.slane %v415_v31, %v4414_v7  ;;  %v712_v47 = vcombine.high %v415_v31, %v415_v31 }
  0x12   :  { %4304 = vset.pattern.permute.xlu0 %v4379_v22  ;;  %v4178_v30 = vld.sshfl [vmem:[%s5532_s0 + $0x12] sm:$0x33 pattern:$0x76325410]  ;;  %4170 = vmatprep.subr.msk.bf16.mxu0 %vm67_vm0, %v62_v24  ;;  %vm63_vm1 = vcmask 31744   ;;  %v125_v34 = vsel %vm67_vm0, %v4172_v23, 0  ;;  %v179_v35 = vcombine.high %v4175_v26, %v4175_v26  ;;  %v654_v38 = vrot.slane %v640_v29, %v4414_v7 }
  0x13   :  { %75 = vmatpush1.bf16.msra.mxu0 %v69_v25  ;;  %v4181_v36 = vld.sshfl [vmem:[%s5532_s0 + $0x18] sm:$0x33 pattern:$0x76325410]  ;;  %4173 = vmatprep.subr.msk.bf16.mxu1 %vm67_vm0, %v123_v33  ;;  %v235_v37 = vcombine.high %v4178_v30, %v4178_v30  ;;  %v655_v39 = vcombine.high %v647_v27, %v647_v27  ;;  %v181_v41 = vsel %vm67_vm0, %v4175_v26, 0  ;;  %v237_v44 = vsel %vm67_vm0, %v4178_v30, 0 }
  0x14   :  { %v4184_v42 = vld.sshfl [vmem:[%s5532_s0 + $0x1e] sm:$0x33 pattern:$0x76325410]  ;;  %131 = vmatpush1.bf16.msra.mxu1 %v125_v34  ;;  %v291_v43 = vcombine.high %v4181_v36, %v4181_v36  ;;  %4176 = vmatprep.subr.msk.bf16.mxu0 %vm67_vm0, %v179_v35  ;;  %v727_v46 = vcombine.high %v719_v40, %v719_v40  ;;  %v293_v49 = vsel %vm67_vm0, %v4181_v36, 0  ;;  %v726_v51 = vrot.slane %v712_v47, %v4414_v7  ;;  %s4381_s29 = smov 112  }
  0x15   :  { %586 = vrot.lane.b32.xlu1 %v583_v18, %s4378_s16  ;;  %584 = vrot.lane.b32.xlu0 %v575_v17, %s4378_s16  ;;  %v347_v45 = vcombine.high %v4184_v42, %v4184_v42  ;;  %v416_v48 = vld [vmem:[%s5532_s0 + $0x1e] sm:$0x3f]  ;;  %v349_v54 = vsel %vm67_vm0, %v4184_v42, 0  ;;  %v868_v60 = vld [vmem:[%s5532_s0 + $0x6] sm:$0x3f]  ;;  %s4382_s15 = smov 111  }
  0x16   :  { %4171 = vmatmul.mubr.msk.bf16.vlgmr.msra.gmra.mrb[0].mxu0 %vm63_vm1, %v4463_v32  ;;  %4179 = vmatprep.subr.msk.bf16.mxu1 %vm67_vm0, %v235_v37  ;;  %v791_v50 = vrot.slane %v416_v48, %v4414_v7  ;;  %v784_v52 = vcombine.high %v416_v48, %v416_v48  ;;  %v867_v53 = vld [vmem:[%s5532_s0] sm:$0x3f]  ;;  %v959_v61 = vrot.slane %v868_v60, %v4414_v7  ;;  %v869_v1 = vld [vmem:[%s5532_s0 + $0xc] sm:$0x3f]  ;;  %v870_v8 = vld [vmem:[%s5532_s0 + $0x12] sm:$0x3f] }
  0x17   :  { %218 = vmatprep.mubr.bf16.mxu0 %v4379_v22  ;;  %187 = vmatpush1.bf16.msra.mxu0 %v181_v41  ;;  %v883_v57 = vrot.slane %v867_v53, %v4414_v7  ;;  %v876_v59 = vcombine.high %v867_v53, %v867_v53  ;;  %v952_v63 = vcombine.high %v868_v60, %v868_v60  ;;  %v871_v12 = vld [vmem:[%s5532_s0 + $0x18] sm:$0x3f]  ;;  %v872_v18 = vld [vmem:[%s5532_s0 + $0x1e] sm:$0x3f]  ;;  %v1340_v29 = vld [vmem:[%s5532_s0 + $0x6] sm:$0x3f] }
  0x18   :  { %4174 = vmatmul.mubr.msk.bf16.vlgmr.msra.gmra.mrb[0].mxu1 %vm63_vm1, %v4463_v32  ;;  %4182 = vmatprep.subr.msk.bf16.mxu0 %vm67_vm0, %v291_v43  ;;  %v798_v55 = vrot.slane %v784_v52, %v4414_v7  ;;  %v799_v56 = vcombine.high %v791_v50, %v791_v50  ;;  %v967_v3 = vcombine.high %v959_v61, %v959_v61  ;;  %v1339_v23 = vld [vmem:[%s5532_s0] sm:$0x3f]  ;;  %v1341_v33 = vld [vmem:[%s5532_s0 + $0xc] sm:$0x3f]  ;;  %v1343_v43 = vld [vmem:[%s5532_s0 + $0x18] sm:$0x3f] }
  0x19   :  { %656 = vrot.lane.b32.xlu1 %v647_v27, %s4378_s16  ;;  %588 = vrot.lane.b32.xlu0 %v582_v28, %s4378_s16  ;;  %v891_v58 = vcombine.high %v883_v57, %v883_v57  ;;  %v890_v62 = vrot.slane %v876_v59, %v4414_v7  ;;  %v966_v2 = vrot.slane %v952_v63, %v4414_v7  ;;  %v1807_v53 = vld [vmem:[%s5532_s0] sm:$0x3f]  ;;  %v1808_v59 = vld [vmem:[%s5532_s0 + $0x6] sm:$0x3f]  ;;  %vm442_vm2 = vcmask 1039360   ;;  %s4383_s30 = smov 110  }
  0x1a   :  { %243 = vmatpush1.bf16.msra.mxu1 %v237_v44  ;;  %274 = vmatprep.mubr.bf16.mxu1 %v4379_v22  ;;  %v1031_v4 = vrot.slane %v869_v1, %v4414_v7  ;;  %v1024_v6 = vcombine.high %v869_v1, %v869_v1  ;;  %v1103_v9 = vrot.slane %v870_v8, %v4414_v7  ;;  %v1809_v63 = vld [vmem:[%s5532_s0 + $0xc] sm:$0x3f]  ;;  %vm898_vm3 = vcmask 1031168   ;;  %s4384_s18 = smov 96   ;;  %s4385_s6 = smov 95  }
  0x1b   :  { %4185 = vmatprep.subr.msk.bf16.mxu1 %vm67_vm0, %v347_v45  ;;  %v1096_v11 = vcombine.high %v870_v8, %v870_v8  ;;  %v1175_v15 = vrot.slane %v871_v12, %v4414_v7  ;;  %v1168_v17 = vcombine.high %v871_v12, %v871_v12  ;;  %v1247_v19 = vrot.slane %v872_v18, %v4414_v7  ;;  %s4386_s21 = smov 94  }
  0x1c   :  { %v1039_v5 = vcombine.high %v1031_v4, %v1031_v4  ;;  %v1038_v10 = vrot.slane %v1024_v6, %v4414_v7  ;;  %v1111_v14 = vcombine.high %v1103_v9, %v1103_v9  ;;  %v1240_v21 = vcombine.high %v872_v18, %v872_v18  ;;  %v1811_v18 = vld [vmem:[%s5532_s0 + $0x18] sm:$0x3f] }
  0x1d   :  { %660 = vrot.lane.b32.xlu1 %v654_v38, %s4378_s16  ;;  %658 = vrot.lane.b32.xlu0 %v655_v39, %s4378_s16  ;;  %v1110_v13 = vrot.slane %v1096_v11, %v4414_v7  ;;  %v1183_v16 = vcombine.high %v1175_v15, %v1175_v15  ;;  %v1182_v20 = vrot.slane %v1168_v17, %v4414_v7  ;;  %v1342_v39 = vld [vmem:[%s5532_s0 + $0x12] sm:$0x3f]  ;;  %vm1370_vm4 = vcmask 916480  }
  0x1e   :  { %4177 = vmatmul.mubr.msk.bf16.vlgmr.msra.gmra.mrb[4].mxu0 %vm63_vm1, %v4463_v32  ;;  %v1254_v24 = vrot.slane %v1240_v21, %v4414_v7  ;;  %v1255_v25 = vcombine.high %v1247_v19, %v1247_v19  ;;  %v1355_v26 = vrot.slane %v1339_v23, %v4414_v7  ;;  %v1348_v28 = vcombine.high %v1339_v23, %v1339_v23  ;;  %v4650_v21 = vld [vmem:[%s5533_s1 + $0x4] sm:$0xf] }
  0x1f   :  { %299 = vmatpush1.bf16.msra.mxu0 %v293_v49  ;;  %330 = vmatprep.mubr.bf16.mxu0 %v4379_v22  ;;  %v1431_v30 = vrot.slane %v1340_v29, %v4414_v7  ;;  %v1503_v36 = vrot.slane %v1341_v33, %v4414_v7  ;;  %v1496_v38 = vcombine.high %v1341_v33, %v1341_v33  ;;  %v1344_v49 = vld [vmem:[%s5532_s0 + $0x1e] sm:$0x3f]  ;;  %vm1838_vm5 = vcmask 908288  }
  0x20   :  { %4180 = vmatmul.mubr.msk.bf16.vlgmr.msra.gmra.mrb[4].mxu1 %vm63_vm1, %v4463_v32  ;;  %v1363_v27 = vcombine.high %v1355_v26, %v1355_v26  ;;  %v1362_v31 = vrot.slane %v1348_v28, %v4414_v7  ;;  %v1568_v42 = vcombine.high %v1342_v39, %v1342_v39  ;;  %v1640_v48 = vcombine.high %v1343_v43, %v1343_v43  ;;  %v1812_v33 = vld [vmem:[%s5532_s0 + $0x1e] sm:$0x3f] }
  0x21   :  { %730 = vrot.lane.b32.xlu1 %v727_v46, %s4378_s16  ;;  %728 = vrot.lane.b32.xlu0 %v719_v40, %s4378_s16  ;;  %v1439_v35 = vcombine.high %v1431_v30, %v1431_v30  ;;  %v1511_v37 = vcombine.high %v1503_v36, %v1503_v36  ;;  %v1575_v40 = vrot.slane %v1342_v39, %v4414_v7  ;;  %vm2294_vm6 = vcmask 900096  }
  0x22   :  { %355 = vmatpush1.bf16.msra.mxu1 %v349_v54  ;;  %386 = vmatprep.mubr.bf16.mxu1 %v4379_v22  ;;  %v1510_v41 = vrot.slane %v1496_v38, %v4414_v7  ;;  %v1582_v44 = vrot.slane %v1568_v42, %v4414_v7  ;;  %v1647_v46 = vrot.slane %v1343_v43, %v4414_v7  ;;  %v2263_v42 = vld [vmem:[%s5532_s0] sm:$0x3f]  ;;  %vm2762_vm7 = vcmask 785408  }
  0x23   :  { %v1583_v45 = vcombine.high %v1575_v40, %v1575_v40  ;;  %v1712_v52 = vcombine.high %v1344_v49, %v1344_v49  ;;  %v1899_v60 = vrot.slane %v1808_v59, %v4414_v7  ;;  %v1964_v8 = vcombine.high %v1809_v63, %v1809_v63 }
  0x24   :  { %v1655_v47 = vcombine.high %v1647_v46, %v1647_v46  ;;  %v2115_v28 = vrot.slane %v1811_v18, %v4414_v7  ;;  %v2187_v38 = vrot.slane %v1812_v33, %v4414_v7  ;;  %vm3230_vm8 = vcmask 777216  }
  0x25   :  { %800 = vrot.lane.b32.xlu1 %v791_v50, %s4378_s16  ;;  %732 = vrot.lane.b32.xlu0 %v726_v51, %s4378_s16  ;;  %v1719_v50 = vrot.slane %v1344_v49, %v4414_v7  ;;  %v1654_v51 = vrot.slane %v1640_v48, %v4414_v7  ;;  %v1726_v54 = vrot.slane %v1712_v52, %v4414_v7  ;;  %vm3686_vm11 = vcmask 769024  }
  0x26   :  { %4183 = vmatmul.mubr.msk.bf16.vlgmr.msra.gmra.mrb[8].mxu0 %vm63_vm1, %v4463_v32  ;;  %v2195_v49 = vcombine.high %v2187_v38, %v2187_v38 }
  0x27   :  { %486 = vmatprep.mubr.bf16.mxu0 %v4379_v22 }
  0x28   :  { %4186 = vmatmul.mubr.msk.bf16.vlgmr.msra.gmra.mrb[8].mxu1 %vm63_vm1, %v4463_v32  ;;  %v1424_v32 = vcombine.high %v1340_v29, %v1340_v29 }
  0x29   :  { %804 = vrot.lane.b32.xlu1 %v798_v55, %s4378_s16  ;;  %802 = vrot.lane.b32.xlu0 %v799_v56, %s4378_s16  ;;  %v1727_v55 = vcombine.high %v1719_v50, %v1719_v50  ;;  %v1823_v56 = vrot.slane %v1807_v53, %v4414_v7 }
  0x2a   :  { %558 = vmatprep.mubr.bf16.mxu1 %v4379_v22  ;;  %v1438_v34 = vrot.slane %v1424_v32, %v4414_v7  ;;  %v2108_v32 = vcombine.high %v1811_v18, %v1811_v18 }
  0x2c   :  { %v2122_v39 = vrot.slane %v2108_v32, %v4414_v7 }
  0x2d   :  { %894 = vrot.lane.b32.xlu1 %v891_v58, %s4380_s17  ;;  %892 = vrot.lane.b32.xlu0 %v883_v57, %s4380_s17  ;;  %v1831_v57 = vcombine.high %v1823_v56, %v1823_v56  ;;  %v1816_v58 = vcombine.high %v1807_v53, %v1807_v53 }
  0x31   :  { %968 = vrot.lane.b32.xlu1 %v959_v61, %s4380_s17  ;;  %896 = vrot.lane.b32.xlu0 %v890_v62, %s4380_s17  ;;  %v1830_v61 = vrot.slane %v1816_v58, %v4414_v7  ;;  %v1892_v62 = vcombine.high %v1808_v59, %v1808_v59 }
  0x33   :  { %v1906_v1 = vrot.slane %v1892_v62, %v4414_v7 }
  0x35   :  { %972 = vrot.lane.b32.xlu1 %v966_v2, %s4380_s17  ;;  %970 = vrot.lane.b32.xlu0 %v967_v3, %s4380_s17  ;;  %v1907_v2 = vcombine.high %v1899_v60, %v1899_v60  ;;  %v1971_v3 = vrot.slane %v1809_v63, %v4414_v7 }
  0x37   :  { %v1979_v6 = vcombine.high %v1971_v3, %v1971_v3 }
  0x39   :  { %1042 = vrot.lane.b32.xlu1 %v1039_v5, %s4380_s17  ;;  %1040 = vrot.lane.b32.xlu0 %v1031_v4, %s4380_s17 }
  0x3d   :  { %1112 = vrot.lane.b32.xlu1 %v1103_v9, %s4380_s17  ;;  %1044 = vrot.lane.b32.xlu0 %v1038_v10, %s4380_s17  ;;  %v1810_v9 = vld [vmem:[%s5532_s0 + $0x12] sm:$0x3f] }
  0x3e   :  { %v2036_v17 = vcombine.high %v1810_v9, %v1810_v9 }
  0x41   :  { %1116 = vrot.lane.b32.xlu1 %v1110_v13, %s4380_s17  ;;  %1114 = vrot.lane.b32.xlu0 %v1111_v14, %s4380_s17 }
  0x45   :  { %1186 = vrot.lane.b32.xlu1 %v1183_v16, %s4380_s17  ;;  %1184 = vrot.lane.b32.xlu0 %v1175_v15, %s4380_s17  ;;  %v2043_v15 = vrot.slane %v1810_v9, %v4414_v7  ;;  %v1978_v16 = vrot.slane %v1964_v8, %v4414_v7 }
  0x49   :  { %1256 = vrot.lane.b32.xlu1 %v1247_v19, %s4380_s17  ;;  %1188 = vrot.lane.b32.xlu0 %v1182_v20, %s4380_s17 }
  0x4d   :  { %1260 = vrot.lane.b32.xlu1 %v1254_v24, %s4380_s17  ;;  %1258 = vrot.lane.b32.xlu0 %v1255_v25, %s4380_s17 }
  0x51   :  { %1366 = vrot.lane.b32.xlu1 %v1363_v27, %s4381_s29  ;;  %1364 = vrot.lane.b32.xlu0 %v1355_v26, %s4381_s29  ;;  %v2050_v26 = vrot.slane %v2036_v17, %v4414_v7  ;;  %v2051_v27 = vcombine.high %v2043_v15, %v2043_v15 }
  0x55   :  { %1440 = vrot.lane.b32.xlu1 %v1431_v30, %s4381_s29  ;;  %1368 = vrot.lane.b32.xlu0 %v1362_v31, %s4381_s29  ;;  %v2123_v31 = vcombine.high %v2115_v28, %v2115_v28 }
  0x59   :  { %1444 = vrot.lane.b32.xlu1 %v1438_v34, %s4381_s29  ;;  %1442 = vrot.lane.b32.xlu0 %v1439_v35, %s4381_s29 }
  0x5d   :  { %1514 = vrot.lane.b32.xlu1 %v1511_v37, %s4381_s29  ;;  %1512 = vrot.lane.b32.xlu0 %v1503_v36, %s4381_s29 }
  0x61   :  { %1584 = vrot.lane.b32.xlu1 %v1575_v40, %s4381_s29  ;;  %1516 = vrot.lane.b32.xlu0 %v1510_v41, %s4381_s29  ;;  %v2180_v40 = vcombine.high %v1812_v33, %v1812_v33 }
  0x63   :  { %v2194_v48 = vrot.slane %v2180_v40, %v4414_v7 }
  0x65   :  { %1588 = vrot.lane.b32.xlu1 %v1582_v44, %s4381_s29  ;;  %1586 = vrot.lane.b32.xlu0 %v1583_v45, %s4381_s29 }
  0x69   :  { %1658 = vrot.lane.b32.xlu1 %v1655_v47, %s4381_s29  ;;  %1656 = vrot.lane.b32.xlu0 %v1647_v46, %s4381_s29 }
  0x6d   :  { %1728 = vrot.lane.b32.xlu1 %v1719_v50, %s4381_s29  ;;  %1660 = vrot.lane.b32.xlu0 %v1654_v51, %s4381_s29  ;;  %v2279_v50 = vrot.slane %v2263_v42, %v4414_v7 }
  0x6f   :  { %v2287_v53 = vcombine.high %v2279_v50, %v2279_v50 }
  0x71   :  { %1732 = vrot.lane.b32.xlu1 %v1726_v54, %s4381_s29  ;;  %1730 = vrot.lane.b32.xlu0 %v1727_v55, %s4381_s29  ;;  %v2272_v54 = vcombine.high %v2263_v42, %v2263_v42  ;;  %v2264_v55 = vld [vmem:[%s5532_s0 + $0x6] sm:$0x3f] }
  0x72   :  { %v2348_v62 = vcombine.high %v2264_v55, %v2264_v55 }
  0x74   :  { %v2362_v8 = vrot.slane %v2348_v62, %v4414_v7 }
  0x75   :  { %1834 = vrot.lane.b32.xlu1 %v1831_v57, %s4382_s15  ;;  %1832 = vrot.lane.b32.xlu0 %v1823_v56, %s4382_s15 }
  0x79   :  { %1908 = vrot.lane.b32.xlu1 %v1899_v60, %s4382_s15  ;;  %1836 = vrot.lane.b32.xlu0 %v1830_v61, %s4382_s15  ;;  %v2355_v60 = vrot.slane %v2264_v55, %v4414_v7  ;;  %v2286_v61 = vrot.slane %v2272_v54, %v4414_v7 }
  0x7b   :  { %v441_v4 = vpop.permute.xlu1 %440  ;;  %v437_v5 = vpop.permute.xlu0 %436  ;;  %v2363_v9 = vcombine.high %v2355_v60, %v2355_v60 }
  0x7d   :  { %1912 = vrot.lane.b32.xlu1 %v1906_v1, %s4382_s15  ;;  %1910 = vrot.lane.b32.xlu0 %v1907_v2, %s4382_s15  ;;  %v2265_v1 = vld [vmem:[%s5532_s0 + $0xc] sm:$0x3f] }
  0x7f   :  { %v513_v10 = vpop.permute.xlu1 %512  ;;  %v439_v11 = vpop.permute.xlu0 %438 }
  0x80   :  { %v443_v12 = vsel %vm442_vm2, %v437_v5, %v439_v11  ;;  %v444_v13 = vsel %vm442_vm2, %v439_v11, %v441_v4 }
  0x81   :  { %1982 = vrot.lane.b32.xlu1 %v1979_v6, %s4382_s15  ;;  %1980 = vrot.lane.b32.xlu0 %v1971_v3, %s4382_s15  ;;  %v449_v14 = vsel %vm67_vm0, %v443_v12, 0 }
  0x82   :  { %4188 = vmatprep.subr.msk.bf16.mxu0 %vm67_vm0, %v444_v13 }
  0x83   :  { %455 = vmatpush1.bf16.msra.mxu0 %v449_v14  ;;  %v517_v19 = vpop.permute.xlu1 %516  ;;  %v515_v20 = vpop.permute.xlu0 %514  ;;  %v2420_v14 = vcombine.high %v2265_v1, %v2265_v1 }
  0x84   :  { %v518_v23 = vsel %vm442_vm2, %v513_v10, %v515_v20  ;;  %v519_v24 = vsel %vm442_vm2, %v515_v20, %v517_v19  ;;  %v2427_v10 = vrot.slane %v2265_v1, %v4414_v7 }
  0x85   :  { %2052 = vrot.lane.b32.xlu1 %v2043_v15, %s4382_s15  ;;  %1984 = vrot.lane.b32.xlu0 %v1978_v16, %s4382_s15  ;;  %v521_v25 = vsel %vm67_vm0, %v518_v23, 0  ;;  %v2266_v15 = vld [vmem:[%s5532_s0 + $0x12] sm:$0x3f]  ;;  %v2434_v23 = vrot.slane %v2420_v14, %v4414_v7 }
  0x86   :  { %4190 = vmatprep.subr.msk.bf16.mxu1 %vm67_vm0, %v519_v24  ;;  %4189 = vmatmul.mubr.msk.bf16.vlgmr.msra.gmra.mrb[12].mxu0 %vm63_vm1, %v4650_v21  ;;  %v2435_v13 = vcombine.high %v2427_v10, %v2427_v10  ;;  %v2499_v20 = vrot.slane %v2266_v15, %v4414_v7  ;;  %v2492_v24 = vcombine.high %v2266_v15, %v2266_v15 }
  0x87   :  { %527 = vmatpush1.bf16.msra.mxu1 %v521_v25  ;;  %v587_v29 = vpop.permute.xlu1 %586  ;;  %v585_v30 = vpop.permute.xlu0 %584  ;;  %630 = vmatprep.mubr.bf16.mxu0 %v4379_v22 }
  0x88   :  { %v590_v34 = vsel %vm442_vm2, %v585_v30, %v587_v29  ;;  %v2506_v32 = vrot.slane %v2492_v24, %v4414_v7  ;;  %v2507_v33 = vcombine.high %v2499_v20, %v2499_v20 }
  0x89   :  { %2056 = vrot.lane.b32.xlu1 %v2050_v26, %s4382_s15  ;;  %2054 = vrot.lane.b32.xlu0 %v2051_v27, %s4382_s15  ;;  %v593_v41 = vsel %vm67_vm0, %v590_v34, 0 }
  0x8a   :  { %4191 = vmatmul.mubr.msk.bf16.vlgmr.msra.gmra.mrb[12].mxu1 %vm63_vm1, %v4650_v21 }
  0x8b   :  { %v657_v35 = vpop.permute.xlu1 %656  ;;  %v589_v36 = vpop.permute.xlu0 %588  ;;  %702 = vmatprep.mubr.bf16.mxu1 %v4379_v22 }
  0x8c   :  { %v591_v37 = vsel %vm442_vm2, %v587_v29, %v589_v36 }
  0x8d   :  { %2126 = vrot.lane.b32.xlu1 %v2123_v31, %s4382_s15  ;;  %2124 = vrot.lane.b32.xlu0 %v2115_v28, %s4382_s15  ;;  %v4745_v28 = vld [vmem:[%s5533_s1 + $0x8] sm:$0xf] }
  0x8e   :  { %4192 = vmatprep.subr.msk.bf16.mxu0 %vm67_vm0, %v591_v37 }
  0x8f   :  { %599 = vmatpush1.bf16.msra.mxu0 %v593_v41  ;;  %v661_v43 = vpop.permute.xlu1 %660  ;;  %v659_v44 = vpop.permute.xlu0 %658 }
  0x90   :  { %v662_v45 = vsel %vm442_vm2, %v657_v35, %v659_v44  ;;  %v663_v46 = vsel %vm442_vm2, %v659_v44, %v661_v43 }
  0x91   :  { %2196 = vrot.lane.b32.xlu1 %v2187_v38, %s4382_s15  ;;  %2128 = vrot.lane.b32.xlu0 %v2122_v39, %s4382_s15  ;;  %v665_v47 = vsel %vm67_vm0, %v662_v45, 0  ;;  %v2268_v39 = vld [vmem:[%s5532_s0 + $0x1e] sm:$0x3f] }
  0x92   :  { %4194 = vmatprep.subr.msk.bf16.mxu1 %vm67_vm0, %v663_v46  ;;  %4193 = vmatmul.mubr.msk.bf16.vlgmr.msra.gmra.mrb[16].mxu0 %vm63_vm1, %v4650_v21  ;;  %v2643_v44 = vrot.slane %v2268_v39, %v4414_v7  ;;  %v2636_v46 = vcombine.high %v2268_v39, %v2268_v39 }
  0x93   :  { %671 = vmatpush1.bf16.msra.mxu1 %v665_v47  ;;  %v731_v51 = vpop.permute.xlu1 %730  ;;  %v729_v52 = vpop.permute.xlu0 %728  ;;  %774 = vmatprep.mubr.bf16.mxu0 %v4379_v22 }
  0x94   :  { %v734_v56 = vsel %vm442_vm2, %v729_v52, %v731_v51  ;;  %v2650_v54 = vrot.slane %v2636_v46, %v4414_v7  ;;  %v2651_v55 = vcombine.high %v2643_v44, %v2643_v44 }
  0x95   :  { %2200 = vrot.lane.b32.xlu1 %v2194_v48, %s4382_s15  ;;  %2198 = vrot.lane.b32.xlu0 %v2195_v49, %s4382_s15  ;;  %v737_v63 = vsel %vm67_vm0, %v734_v56, 0  ;;  %v2731_v48 = vld [vmem:[%s5532_s0] sm:$0x3f] }
  0x96   :  { %4195 = vmatmul.mubr.msk.bf16.vlgmr.msra.gmra.mrb[16].mxu1 %vm63_vm1, %v4650_v21  ;;  %v2747_v56 = vrot.slane %v2731_v48, %v4414_v7 }
  0x97   :  { %v801_v57 = vpop.permute.xlu1 %800  ;;  %v733_v58 = vpop.permute.xlu0 %732  ;;  %846 = vmatprep.mubr.bf16.mxu1 %v4379_v22 }
  0x98   :  { %v735_v59 = vsel %vm442_vm2, %v731_v51, %v733_v58 }
  0x99   :  { %2290 = vrot.lane.b32.xlu1 %v2287_v53, %s4383_s30  ;;  %2288 = vrot.lane.b32.xlu0 %v2279_v50, %s4383_s30 }
  0x9a   :  { %4196 = vmatprep.subr.msk.bf16.mxu0 %vm67_vm0, %v735_v59  ;;  %v2755_v59 = vcombine.high %v2747_v56, %v2747_v56 }
  0x9b   :  { %743 = vmatpush1.bf16.msra.mxu0 %v737_v63  ;;  %v805_v2 = vpop.permute.xlu1 %804  ;;  %v803_v3 = vpop.permute.xlu0 %802 }
  0x9c   :  { %v806_v4 = vsel %vm442_vm2, %v801_v57, %v803_v3  ;;  %v807_v5 = vsel %vm442_vm2, %v803_v3, %v805_v2 }
  0x9d   :  { %2364 = vrot.lane.b32.xlu1 %v2355_v60, %s4383_s30  ;;  %2292 = vrot.lane.b32.xlu0 %v2286_v61, %s4383_s30  ;;  %v809_v6 = vsel %vm67_vm0, %v806_v4, 0  ;;  %v2740_v60 = vcombine.high %v2731_v48, %v2731_v48  ;;  %v2732_v61 = vld [vmem:[%s5532_s0 + $0x6] sm:$0x3f] }
  0x9e   :  { %4198 = vmatprep.subr.msk.bf16.mxu1 %vm67_vm0, %v807_v5  ;;  %4197 = vmatmul.mubr.msk.bf16.vlgmr.msra.gmra.mrb[20].mxu0 %vm63_vm1, %v4650_v21  ;;  %v2823_v3 = vrot.slane %v2732_v61, %v4414_v7  ;;  %v2816_v5 = vcombine.high %v2732_v61, %v2732_v61 }
  0x9f   :  { %815 = vmatpush1.bf16.msra.mxu1 %v809_v6  ;;  %v895_v11 = vpop.permute.xlu1 %894  ;;  %v893_v12 = vpop.permute.xlu0 %892  ;;  %942 = vmatprep.mubr.bf16.mxu0 %v4379_v22  ;;  %v2754_v4 = vrot.slane %v2740_v60, %v4414_v7 }
  0xa0   :  { %v899_v16 = vsel %vm898_vm3, %v893_v12, %v895_v11  ;;  %v2830_v14 = vrot.slane %v2816_v5, %v4414_v7  ;;  %v2831_v15 = vcombine.high %v2823_v3, %v2823_v3 }
  0xa1   :  { %2368 = vrot.lane.b32.xlu1 %v2362_v8, %s4383_s30  ;;  %2366 = vrot.lane.b32.xlu0 %v2363_v9, %s4383_s30  ;;  %v905_v25 = vsel %vm67_vm0, %v899_v16, 0  ;;  %v2733_v8 = vld [vmem:[%s5532_s0 + $0xc] sm:$0x3f] }
  0xa2   :  { %4199 = vmatmul.mubr.msk.bf16.vlgmr.msra.gmra.mrb[20].mxu1 %vm63_vm1, %v4650_v21  ;;  %v2267_v21 = vld [vmem:[%s5532_s0 + $0x18] sm:$0x3f]  ;;  %v2895_v16 = vrot.slane %v2733_v8, %v4414_v7 }
  0xa3   :  { %v969_v17 = vpop.permute.xlu1 %968  ;;  %v897_v18 = vpop.permute.xlu0 %896  ;;  %1014 = vmatprep.mubr.bf16.mxu1 %v4379_v22  ;;  %v2571_v34 = vrot.slane %v2267_v21, %v4414_v7  ;;  %v2564_v38 = vcombine.high %v2267_v21, %v2267_v21 }
  0xa4   :  { %v900_v19 = vsel %vm898_vm3, %v895_v11, %v897_v18 }
  0xa5   :  { %2438 = vrot.lane.b32.xlu1 %v2435_v13, %s4383_s30  ;;  %2436 = vrot.lane.b32.xlu0 %v2427_v10, %s4383_s30  ;;  %v2579_v37 = vcombine.high %v2571_v34, %v2571_v34  ;;  %v2578_v45 = vrot.slane %v2564_v38, %v4414_v7 }
  0xa6   :  { %4201 = vmatprep.subr.msk.bf16.mxu0 %vm67_vm0, %v900_v19  ;;  %v2888_v19 = vcombine.high %v2733_v8, %v2733_v8 }
  0xa7   :  { %911 = vmatpush1.bf16.msra.mxu0 %v905_v25  ;;  %v973_v26 = vpop.permute.xlu1 %972  ;;  %v971_v27 = vpop.permute.xlu0 %970 }
  0xa8   :  { %v974_v29 = vsel %vm898_vm3, %v969_v17, %v971_v27  ;;  %v975_v30 = vsel %vm898_vm3, %v971_v27, %v973_v26 }
  0xa9   :  { %2508 = vrot.lane.b32.xlu1 %v2499_v20, %s4383_s30  ;;  %2440 = vrot.lane.b32.xlu0 %v2434_v23, %s4383_s30  ;;  %v977_v31 = vsel %vm67_vm0, %v974_v29, 0  ;;  %v2903_v20 = vcombine.high %v2895_v16, %v2895_v16  ;;  %v2734_v23 = vld [vmem:[%s5532_s0 + $0x12] sm:$0x3f]  ;;  %v2902_v29 = vrot.slane %v2888_v19, %v4414_v7 }
  0xaa   :  { %4203 = vmatprep.subr.msk.bf16.mxu1 %vm67_vm0, %v975_v30  ;;  %4202 = vmatmul.mubr.msk.bf16.vlgmr.msra.gmra.mrb[24].mxu0 %vm63_vm1, %v4745_v28  ;;  %v2967_v27 = vrot.slane %v2734_v23, %v4414_v7  ;;  %v2960_v30 = vcombine.high %v2734_v23, %v2734_v23 }
  0xab   :  { %983 = vmatpush1.bf16.msra.mxu1 %v977_v31  ;;  %v1043_v35 = vpop.permute.xlu1 %1042  ;;  %v1041_v36 = vpop.permute.xlu0 %1040  ;;  %1086 = vmatprep.mubr.bf16.mxu0 %v4379_v22 }
  0xac   :  { %v1046_v40 = vsel %vm898_vm3, %v1041_v36, %v1043_v35  ;;  %v2974_v38 = vrot.slane %v2960_v30, %v4414_v7  ;;  %v2975_v39 = vcombine.high %v2967_v27, %v2967_v27 }
  0xad   :  { %2512 = vrot.lane.b32.xlu1 %v2506_v32, %s4383_s30  ;;  %2510 = vrot.lane.b32.xlu0 %v2507_v33, %s4383_s30  ;;  %v1049_v47 = vsel %vm67_vm0, %v1046_v40, 0 }
  0xae   :  { %4204 = vmatmul.mubr.msk.bf16.vlgmr.msra.gmra.mrb[24].mxu1 %vm63_vm1, %v4745_v28 }
  0xaf   :  { %v1113_v41 = vpop.permute.xlu1 %1112  ;;  %v1045_v42 = vpop.permute.xlu0 %1044  ;;  %1158 = vmatprep.mubr.bf16.mxu1 %v4379_v22 }
  0xb0   :  { %v1047_v43 = vsel %vm898_vm3, %v1043_v35, %v1045_v42 }
  0xb1   :  { %2582 = vrot.lane.b32.xlu1 %v2579_v37, %s4383_s30  ;;  %2580 = vrot.lane.b32.xlu0 %v2571_v34, %s4383_s30  ;;  %v4840_v34 = vld [vmem:[%s5533_s1 + $0xc] sm:$0xf] }
  0xb2   :  { %4205 = vmatprep.subr.msk.bf16.mxu0 %vm67_vm0, %v1047_v43 }
  0xb3   :  { %1055 = vmatpush1.bf16.msra.mxu0 %v1049_v47  ;;  %v1117_v49 = vpop.permute.xlu1 %1116  ;;  %v1115_v50 = vpop.permute.xlu0 %1114 }
  0xb4   :  { %v1118_v51 = vsel %vm898_vm3, %v1113_v41, %v1115_v50  ;;  %v1119_v52 = vsel %vm898_vm3, %v1115_v50, %v1117_v49 }
  0xb5   :  { %2652 = vrot.lane.b32.xlu1 %v2643_v44, %s4383_s30  ;;  %2584 = vrot.lane.b32.xlu0 %v2578_v45, %s4383_s30  ;;  %v1121_v53 = vsel %vm67_vm0, %v1118_v51, 0  ;;  %v2736_v45 = vld [vmem:[%s5532_s0 + $0x1e] sm:$0x3f] }
  0xb6   :  { %4207 = vmatprep.subr.msk.bf16.mxu1 %vm67_vm0, %v1119_v52  ;;  %4206 = vmatmul.mubr.msk.bf16.vlgmr.msra.gmra.mrb[28].mxu0 %vm63_vm1, %v4745_v28  ;;  %v3111_v50 = vrot.slane %v2736_v45, %v4414_v7  ;;  %v3104_v52 = vcombine.high %v2736_v45, %v2736_v45 }
  0xb7   :  { %1127 = vmatpush1.bf16.msra.mxu1 %v1121_v53  ;;  %v1187_v57 = vpop.permute.xlu1 %1186  ;;  %v1185_v58 = vpop.permute.xlu0 %1184  ;;  %1230 = vmatprep.mubr.bf16.mxu0 %v4379_v22 }
  0xb8   :  { %v1190_v62 = vsel %vm898_vm3, %v1185_v58, %v1187_v57  ;;  %v3118_v60 = vrot.slane %v3104_v52, %v4414_v7  ;;  %v3119_v61 = vcombine.high %v3111_v50, %v3111_v50 }
  0xb9   :  { %2656 = vrot.lane.b32.xlu1 %v2650_v54, %s4383_s30  ;;  %2654 = vrot.lane.b32.xlu0 %v2651_v55, %s4383_s30  ;;  %v1193_v6 = vsel %vm67_vm0, %v1190_v62, 0  ;;  %v3199_v54 = vld [vmem:[%s5532_s0] sm:$0x3f] }
  0xba   :  { %4208 = vmatmul.mubr.msk.bf16.vlgmr.msra.gmra.mrb[28].mxu1 %vm63_vm1, %v4745_v28  ;;  %v3215_v62 = vrot.slane %v3199_v54, %v4414_v7 }
  0xbb   :  { %v1257_v63 = vpop.permute.xlu1 %1256  ;;  %v1189_v1 = vpop.permute.xlu0 %1188  ;;  %1302 = vmatprep.mubr.bf16.mxu1 %v4379_v22 }
  0xbc   :  { %v1191_v2 = vsel %vm898_vm3, %v1187_v57, %v1189_v1 }
  0xbd   :  { %2758 = vrot.lane.b32.xlu1 %v2755_v59, %s4384_s18  ;;  %2756 = vrot.lane.b32.xlu0 %v2747_v56, %s4384_s18 }
  0xbe   :  { %4209 = vmatprep.subr.msk.bf16.mxu0 %vm67_vm0, %v1191_v2  ;;  %v3223_v2 = vcombine.high %v3215_v62, %v3215_v62 }
  0xbf   :  { %1199 = vmatpush1.bf16.msra.mxu0 %v1193_v6  ;;  %v1261_v9 = vpop.permute.xlu1 %1260  ;;  %v1259_v10 = vpop.permute.xlu0 %1258 }
  0xc0   :  { %v1262_v11 = vsel %vm898_vm3, %v1257_v63, %v1259_v10  ;;  %v1263_v12 = vsel %vm898_vm3, %v1259_v10, %v1261_v9 }
  0xc1   :  { %2832 = vrot.lane.b32.xlu1 %v2823_v3, %s4384_s18  ;;  %2760 = vrot.lane.b32.xlu0 %v2754_v4, %s4384_s18  ;;  %v1265_v13 = vsel %vm67_vm0, %v1262_v11, 0  ;;  %v3208_v3 = vcombine.high %v3199_v54, %v3199_v54  ;;  %v3200_v4 = vld [vmem:[%s5532_s0 + $0x6] sm:$0x3f] }
  0xc2   :  { %4211 = vmatprep.subr.msk.bf16.mxu1 %vm67_vm0, %v1263_v12  ;;  %4210 = vmatmul.mubr.msk.bf16.vlgmr.msra.gmra.mrb[32].mxu0 %vm63_vm1, %v4745_v28  ;;  %v3291_v10 = vrot.slane %v3200_v4, %v4414_v7  ;;  %v3284_v12 = vcombine.high %v3200_v4, %v3200_v4 }
  0xc3   :  { %1271 = vmatpush1.bf16.msra.mxu1 %v1265_v13  ;;  %v1367_v17 = vpop.permute.xlu1 %1366  ;;  %v1365_v18 = vpop.permute.xlu0 %1364  ;;  %1414 = vmatprep.mubr.bf16.mxu0 %v4379_v22  ;;  %v3222_v11 = vrot.slane %v3208_v3, %v4414_v7 }
  0xc4   :  { %v1371_v24 = vsel %vm1370_vm4, %v1365_v18, %v1367_v17  ;;  %v3299_v23 = vcombine.high %v3291_v10, %v3291_v10 }
  0xc5   :  { %2836 = vrot.lane.b32.xlu1 %v2830_v14, %s4384_s18  ;;  %2834 = vrot.lane.b32.xlu0 %v2831_v15, %s4384_s18  ;;  %v1377_v31 = vsel %vm67_vm0, %v1371_v24, 0  ;;  %v3201_v14 = vld [vmem:[%s5532_s0 + $0xc] sm:$0x3f] }
  0xc6   :  { %4212 = vmatmul.mubr.msk.bf16.vlgmr.msra.gmra.mrb[32].mxu1 %vm63_vm1, %v4745_v28  ;;  %v2735_v28 = vld [vmem:[%s5532_s0 + $0x18] sm:$0x3f]  ;;  %v3363_v24 = vrot.slane %v3201_v14, %v4414_v7 }
  0xc7   :  { %v1441_v25 = vpop.permute.xlu1 %1440  ;;  %v1369_v21 = vpop.permute.xlu0 %1368  ;;  %1486 = vmatprep.mubr.bf16.mxu1 %v4379_v22  ;;  %v3039_v40 = vrot.slane %v2735_v28, %v4414_v7  ;;  %v3032_v44 = vcombine.high %v2735_v28, %v2735_v28 }
  0xc8   :  { %v1372_v26 = vsel %vm1370_vm4, %v1367_v17, %v1369_v21 }
  0xc9   :  { %2906 = vrot.lane.b32.xlu1 %v2903_v20, %s4384_s18  ;;  %2904 = vrot.lane.b32.xlu0 %v2895_v16, %s4384_s18  ;;  %v3047_v43 = vcombine.high %v3039_v40, %v3039_v40  ;;  %v3046_v51 = vrot.slane %v3032_v44, %v4414_v7  ;;  %v3298_v20 = vrot.slane %v3284_v12, %v4414_v7 }
  0xca   :  { %4214 = vmatprep.subr.msk.bf16.mxu0 %vm67_vm0, %v1372_v26  ;;  %v3371_v26 = vcombine.high %v3363_v24, %v3363_v24 }
  0xcb   :  { %1383 = vmatpush1.bf16.msra.mxu0 %v1377_v31  ;;  %v1445_v32 = vpop.permute.xlu1 %1444  ;;  %v1443_v33 = vpop.permute.xlu0 %1442 }
  0xcc   :  { %v1446_v35 = vsel %vm1370_vm4, %v1441_v25, %v1443_v33  ;;  %v1447_v36 = vsel %vm1370_vm4, %v1443_v33, %v1445_v32 }
  0xcd   :  { %2976 = vrot.lane.b32.xlu1 %v2967_v27, %s4384_s18  ;;  %2908 = vrot.lane.b32.xlu0 %v2902_v29, %s4384_s18  ;;  %v1449_v37 = vsel %vm67_vm0, %v1446_v35, 0  ;;  %v3356_v27 = vcombine.high %v3201_v14, %v3201_v14  ;;  %v3202_v29 = vld [vmem:[%s5532_s0 + $0x12] sm:$0x3f]  ;;  %v3656_v14 = vld [vmem:[%s5532_s0 + $0x6] sm:$0x3f] }
  0xce   :  { %4216 = vmatprep.subr.msk.bf16.mxu1 %vm67_vm0, %v1447_v36  ;;  %4215 = vmatmul.mubr.msk.bf16.vlgmr.msra.gmra.mrb[36].mxu0 %vm63_vm1, %v4840_v34  ;;  %v3435_v33 = vrot.slane %v3202_v29, %v4414_v7  ;;  %v3428_v35 = vcombine.high %v3202_v29, %v3202_v29 }
  0xcf   :  { %1455 = vmatpush1.bf16.msra.mxu1 %v1449_v37  ;;  %v1515_v41 = vpop.permute.xlu1 %1514  ;;  %v1513_v42 = vpop.permute.xlu0 %1512  ;;  %1558 = vmatprep.mubr.bf16.mxu0 %v4379_v22  ;;  %v3203_v37 = vld [vmem:[%s5532_s0 + $0x18] sm:$0x3f] }
  0xd0   :  { %v1518_v46 = vsel %vm1370_vm4, %v1513_v42, %v1515_v41  ;;  %v3442_v44 = vrot.slane %v3428_v35, %v4414_v7  ;;  %v3443_v45 = vcombine.high %v3435_v33, %v3435_v33 }
  0xd1   :  { %2980 = vrot.lane.b32.xlu1 %v2974_v38, %s4384_s18  ;;  %2978 = vrot.lane.b32.xlu0 %v2975_v39, %s4384_s18  ;;  %v1521_v53 = vsel %vm67_vm0, %v1518_v46, 0  ;;  %v3507_v46 = vrot.slane %v3203_v37, %v4414_v7 }
  0xd2   :  { %4217 = vmatmul.mubr.msk.bf16.vlgmr.msra.gmra.mrb[36].mxu1 %vm63_vm1, %v4840_v34 }
  0xd3   :  { %v1585_v47 = vpop.permute.xlu1 %1584  ;;  %v1517_v48 = vpop.permute.xlu0 %1516  ;;  %1630 = vmatprep.mubr.bf16.mxu1 %v4379_v22 }
  0xd4   :  { %v1519_v49 = vsel %vm1370_vm4, %v1515_v41, %v1517_v48 }
  0xd5   :  { %3050 = vrot.lane.b32.xlu1 %v3047_v43, %s4384_s18  ;;  %3048 = vrot.lane.b32.xlu0 %v3039_v40, %s4384_s18  ;;  %v4935_v40 = vld [vmem:[%s5533_s1 + $0x10] sm:$0xf] }
  0xd6   :  { %4218 = vmatprep.subr.msk.bf16.mxu0 %vm67_vm0, %v1519_v49  ;;  %v3515_v49 = vcombine.high %v3507_v46, %v3507_v46 }
  0xd7   :  { %1527 = vmatpush1.bf16.msra.mxu0 %v1521_v53  ;;  %v1589_v55 = vpop.permute.xlu1 %1588  ;;  %v1587_v56 = vpop.permute.xlu0 %1586 }
  0xd8   :  { %v1590_v57 = vsel %vm1370_vm4, %v1585_v47, %v1587_v56  ;;  %v1591_v58 = vsel %vm1370_vm4, %v1587_v56, %v1589_v55 }
  0xd9   :  { %3120 = vrot.lane.b32.xlu1 %v3111_v50, %s4384_s18  ;;  %3052 = vrot.lane.b32.xlu0 %v3046_v51, %s4384_s18  ;;  %v1593_v59 = vsel %vm67_vm0, %v1590_v57, 0  ;;  %v3500_v50 = vcombine.high %v3203_v37, %v3203_v37  ;;  %v3204_v51 = vld [vmem:[%s5532_s0 + $0x1e] sm:$0x3f] }
  0xda   :  { %4220 = vmatprep.subr.msk.bf16.mxu1 %vm67_vm0, %v1591_v58  ;;  %4219 = vmatmul.mubr.msk.bf16.vlgmr.msra.gmra.mrb[40].mxu0 %vm63_vm1, %v4840_v34  ;;  %v3579_v56 = vrot.slane %v3204_v51, %v4414_v7  ;;  %v3572_v58 = vcombine.high %v3204_v51, %v3204_v51 }
  0xdb   :  { %1599 = vmatpush1.bf16.msra.mxu1 %v1593_v59  ;;  %v1659_v63 = vpop.permute.xlu1 %1658  ;;  %v1657_v1 = vpop.permute.xlu0 %1656  ;;  %1702 = vmatprep.mubr.bf16.mxu0 %v4379_v22  ;;  %v3514_v57 = vrot.slane %v3500_v50, %v4414_v7 }
  0xdc   :  { %v1662_v5 = vsel %vm1370_vm4, %v1657_v1, %v1659_v63  ;;  %v3586_v3 = vrot.slane %v3572_v58, %v4414_v7  ;;  %v3587_v4 = vcombine.high %v3579_v56, %v3579_v56 }
  0xdd   :  { %3124 = vrot.lane.b32.xlu1 %v3118_v60, %s4384_s18  ;;  %3122 = vrot.lane.b32.xlu0 %v3119_v61, %s4384_s18  ;;  %v1665_v13 = vsel %vm67_vm0, %v1662_v5, 0  ;;  %v3655_v60 = vld [vmem:[%s5532_s0] sm:$0x3f] }
  0xde   :  { %4221 = vmatmul.mubr.msk.bf16.vlgmr.msra.gmra.mrb[40].mxu1 %vm63_vm1, %v4840_v34  ;;  %v3671_v5 = vrot.slane %v3655_v60, %v4414_v7 }
  0xdf   :  { %v1729_v6 = vpop.permute.xlu1 %1728  ;;  %v1661_v8 = vpop.permute.xlu0 %1660  ;;  %1774 = vmatprep.mubr.bf16.mxu1 %v4379_v22 }
  0xe0   :  { %v1663_v9 = vsel %vm1370_vm4, %v1659_v63, %v1661_v8 }
  0xe1   :  { %3226 = vrot.lane.b32.xlu1 %v3223_v2, %s4385_s6  ;;  %3224 = vrot.lane.b32.xlu0 %v3215_v62, %s4385_s6 }
  0xe2   :  { %4222 = vmatprep.subr.msk.bf16.mxu0 %vm67_vm0, %v1663_v9 }
  0xe3   :  { %1671 = vmatpush1.bf16.msra.mxu0 %v1665_v13  ;;  %v1733_v15 = vpop.permute.xlu1 %1732  ;;  %v1731_v16 = vpop.permute.xlu0 %1730 }
  0xe4   :  { %v1734_v17 = vsel %vm1370_vm4, %v1729_v6, %v1731_v16  ;;  %v1735_v18 = vsel %vm1370_vm4, %v1731_v16, %v1733_v15 }
  0xe5   :  { %v1737_v19 = vsel %vm67_vm0, %v1734_v17, 0  ;;  %3300 = vrot.lane.b32.xlu1 %v3291_v10, %s4385_s6  ;;  %3228 = vrot.lane.b32.xlu0 %v3222_v11, %s4385_s6  ;;  %v3679_v10 = vcombine.high %v3671_v5, %v3671_v5  ;;  %v3664_v11 = vcombine.high %v3655_v60, %v3655_v60 }
  0xe6   :  { %4223 = vmatmul.mubr.msk.bf16.vlgmr.msra.gmra.mrb[44].mxu0 %vm63_vm1, %v4840_v34  ;;  %4224 = vmatprep.subr.msk.bf16.mxu1 %vm67_vm0, %v1735_v18 }
  0xe7   :  { %1743 = vmatpush1.bf16.msra.mxu1 %v1737_v19  ;;  %v1835_v25 = vpop.permute.xlu1 %1834  ;;  %v1833_v21 = vpop.permute.xlu0 %1832  ;;  %1882 = vmatprep.mubr.bf16.mxu0 %v4379_v22 }
  0xe8   :  { %v1839_v30 = vsel %vm1838_vm5, %v1833_v21, %v1835_v25  ;;  %v3678_v21 = vrot.slane %v3664_v11, %v4414_v7 }
  0xe9   :  { %3304 = vrot.lane.b32.xlu1 %v3298_v20, %s4385_s6  ;;  %3302 = vrot.lane.b32.xlu0 %v3299_v23, %s4385_s6  ;;  %v1845_v36 = vsel %vm67_vm0, %v1839_v30, 0  ;;  %v4978_v9 = vpop.f32.mrb[0].mxu0 }
  0xea   :  { %4225 = vmatmul.mubr.msk.bf16.vlgmr.msra.gmra.mrb[44].mxu1 %vm63_vm1, %v4840_v34  ;;  %v3370_v34 = vrot.slane %v3356_v27, %v4414_v7  ;;  %v4984_v13 = vpop.f32.mrb[1].mxu0 }
  0xeb   :  { %v1909_v31 = vpop.permute.xlu1 %1908  ;;  %v1837_v28 = vpop.permute.xlu0 %1836  ;;  %1954 = vmatprep.mubr.bf16.mxu1 %v4379_v22 }
  0xec   :  { %v1840_v32 = vsel %vm1838_vm5, %v1835_v25, %v1837_v28  ;;  %v4982_v12 = vpop.f32.mrb[0].mxu1  ;;  %v112_v16 = vpop.f32.mrb[2].mxu0  ;;  %v3747_v25 = vrot.slane %v3656_v14, %v4414_v7 }
  0xed   :  { %3374 = vrot.lane.b32.xlu1 %v3371_v26, %s4385_s6  ;;  %3372 = vrot.lane.b32.xlu0 %v3363_v24, %s4385_s6  ;;  %v4991_v15 = vpop.f32.mrb[1].mxu1  ;;  %v113_v24 = vpop.f32.mrb[3].mxu0  ;;  %v3740_v26 = vcombine.high %v3656_v14, %v3656_v14 }
  0xee   :  { %4227 = vmatprep.subr.msk.bf16.mxu0 %vm67_vm0, %v1840_v32  ;;  %v168_v23 = vpop.f32.mrb[2].mxu1 }
  0xef   :  { %1851 = vmatpush1.bf16.msra.mxu0 %v1845_v36  ;;  %v1913_v38 = vpop.permute.xlu1 %1912  ;;  %v1911_v39 = vpop.permute.xlu0 %1910 }
  0xf0   :  { %v1914_v41 = vsel %vm1838_vm5, %v1909_v31, %v1911_v39  ;;  %v1915_v42 = vsel %vm1838_vm5, %v1911_v39, %v1913_v38  ;;  %v169_v27 = vpop.f32.mrb[3].mxu1  ;;  %v3657_v31 = vld [vmem:[%s5532_s0 + $0xc] sm:$0x3f] }
  0xf1   :  { %v1917_v43 = vsel %vm67_vm0, %v1914_v41, 0  ;;  %3444 = vrot.lane.b32.xlu1 %v3435_v33, %s4385_s6  ;;  %3376 = vrot.lane.b32.xlu0 %v3370_v34, %s4385_s6  ;;  %v5000_v29 = vpop.f32.mrb[4].mxu0  ;;  %v3754_v41 = vrot.slane %v3740_v26, %v4414_v7 }
  0xf2   :  { %4228 = vmatmul.mubr.msk.bf16.vlgmr.msra.gmra.mrb[48].mxu0 %vm63_vm1, %v4935_v40  ;;  %4229 = vmatprep.subr.msk.bf16.mxu1 %vm67_vm0, %v1915_v42  ;;  %v5009_v32 = vpop.f32.mrb[5].mxu0  ;;  %v3755_v42 = vcombine.high %v3747_v25, %v3747_v25 }
  0xf3   :  { %1923 = vmatpush1.bf16.msra.mxu1 %v1917_v43  ;;  %v1983_v47 = vpop.permute.xlu1 %1982  ;;  %v1981_v48 = vpop.permute.xlu0 %1980  ;;  %2026 = vmatprep.mubr.bf16.mxu0 %v4379_v22  ;;  %v3819_v43 = vrot.slane %v3657_v31, %v4414_v7 }
  0xf4   :  { %v1986_v52 = vsel %vm1838_vm5, %v1981_v48, %v1983_v47  ;;  %v5007_v28 = vpop.f32.mrb[4].mxu1  ;;  %v224_v38 = vpop.f32.mrb[6].mxu0 }
  0xf5   :  { %3448 = vrot.lane.b32.xlu1 %v3442_v44, %s4385_s6  ;;  %3446 = vrot.lane.b32.xlu0 %v3443_v45, %s4385_s6  ;;  %v1989_v59 = vsel %vm67_vm0, %v1986_v52, 0  ;;  %v5013_v37 = vpop.f32.mrb[5].mxu1  ;;  %v225_v45 = vpop.f32.mrb[7].mxu0  ;;  %v3827_v52 = vcombine.high %v3819_v43, %v3819_v43 }
  0xf6   :  { %4230 = vmatmul.mubr.msk.bf16.vlgmr.msra.gmra.mrb[48].mxu1 %vm63_vm1, %v4935_v40  ;;  %v280_v44 = vpop.f32.mrb[6].mxu1 }
  0xf7   :  { %v2053_v53 = vpop.permute.xlu1 %2052  ;;  %v1985_v54 = vpop.permute.xlu0 %1984  ;;  %2098 = vmatprep.mubr.bf16.mxu1 %v4379_v22 }
  0xf8   :  { %v1987_v55 = vsel %vm1838_vm5, %v1983_v47, %v1985_v54 }
  0xf9   :  { %3518 = vrot.lane.b32.xlu1 %v3515_v49, %s4385_s6  ;;  %3516 = vrot.lane.b32.xlu0 %v3507_v46, %s4385_s6  ;;  %v281_v46 = vpop.f32.mrb[7].mxu1  ;;  %v5023_v47 = vpop.f32.mrb[8].mxu0 }
  0xfa   :  { %4231 = vmatprep.subr.msk.bf16.mxu0 %vm67_vm0, %v1987_v55  ;;  %v5028_v51 = vpop.f32.mrb[9].mxu0 }
  0xfb   :  { %1995 = vmatpush1.bf16.msra.mxu0 %v1989_v59  ;;  %v2057_v61 = vpop.permute.xlu1 %2056  ;;  %v2055_v62 = vpop.permute.xlu0 %2054 }
  0xfc   :  { %v2058_v63 = vsel %vm1838_vm5, %v2053_v53, %v2055_v62  ;;  %v2059_v1 = vsel %vm1838_vm5, %v2055_v62, %v2057_v61  ;;  %v5026_v50 = vpop.f32.mrb[8].mxu1  ;;  %v3812_v53 = vcombine.high %v3657_v31, %v3657_v31  ;;  %v336_v55 = vpop.f32.mrb[10].mxu0 }
  0xfd   :  { %v2061_v2 = vsel %vm67_vm0, %v2058_v63, 0  ;;  %3588 = vrot.lane.b32.xlu1 %v3579_v56, %s4385_s6  ;;  %3520 = vrot.lane.b32.xlu0 %v3514_v57, %s4385_s6  ;;  %v5032_v54 = vpop.f32.mrb[9].mxu1  ;;  %v3658_v56 = vld [vmem:[%s5532_s0 + $0x12] sm:$0x3f]  ;;  %v337_v58 = vpop.f32.mrb[11].mxu0 }
  0xfe   :  { %4232 = vmatmul.mubr.msk.bf16.vlgmr.msra.gmra.mrb[52].mxu0 %vm63_vm1, %v4935_v40  ;;  %4233 = vmatprep.subr.msk.bf16.mxu1 %vm67_vm0, %v2059_v1  ;;  %v392_v57 = vpop.f32.mrb[10].mxu1  ;;  %v3826_v1 = vrot.slane %v3812_v53, %v4414_v7 }
  0xff   :  { %2067 = vmatpush1.bf16.msra.mxu1 %v2061_v2  ;;  %v2127_v6 = vpop.permute.xlu1 %2126  ;;  %v2125_v8 = vpop.permute.xlu0 %2124  ;;  %2170 = vmatprep.mubr.bf16.mxu0 %v4379_v22  ;;  %v3884_v2 = vcombine.high %v3658_v56, %v3658_v56 }
 0x100   :  { %v2130_v17 = vsel %vm1838_vm5, %v2125_v8, %v2127_v6  ;;  %v393_v63 = vpop.f32.mrb[11].mxu1  ;;  %v5054_v8 = vld [vmem:[%s5533_s1 + $0x14] sm:$0xf] }
 0x101   :  { %3592 = vrot.lane.b32.xlu1 %v3586_v3, %s4385_s6  ;;  %3590 = vrot.lane.b32.xlu0 %v3587_v4, %s4385_s6  ;;  %v2133_v30 = vsel %vm67_vm0, %v2130_v17, 0  ;;  %v3659_v4 = vld [vmem:[%s5532_s0 + $0x18] sm:$0x3f]  ;;  %v3898_v16 = vrot.slane %v3884_v2, %v4414_v7 }
 0x102   :  { %4234 = vmatmul.mubr.msk.bf16.vlgmr.msra.gmra.mrb[52].mxu1 %vm63_vm1, %v4935_v40  ;;  %v3956_v24 = vcombine.high %v3659_v4, %v3659_v4 }
 0x103   :  { %v2197_v18 = vpop.permute.xlu1 %2196  ;;  %v2129_v19 = vpop.permute.xlu0 %2128  ;;  %2242 = vmatprep.mubr.bf16.mxu1 %v4379_v22 }
 0x104   :  { %v2131_v20 = vsel %vm1838_vm5, %v2127_v6, %v2129_v19 }
 0x105   :  { %3682 = vrot.lane.b32.xlu1 %v3679_v10, %s4386_s21  ;;  %3680 = vrot.lane.b32.xlu0 %v3671_v5, %s4386_s21 }
 0x106   :  { %4235 = vmatprep.subr.msk.bf16.mxu0 %vm67_vm0, %v2131_v20 }
 0x107   :  { %2139 = vmatpush1.bf16.msra.mxu0 %v2133_v30  ;;  %v2201_v33 = vpop.permute.xlu1 %2200  ;;  %v2199_v34 = vpop.permute.xlu0 %2198 }
 0x108   :  { %v2202_v35 = vsel %vm1838_vm5, %v2197_v18, %v2199_v34  ;;  %v2203_v36 = vsel %vm1838_vm5, %v2199_v34, %v2201_v33  ;;  %v3963_v18 = vrot.slane %v3659_v4, %v4414_v7  ;;  %v3970_v33 = vrot.slane %v3956_v24, %v4414_v7 }
 0x109   :  { %v2205_v39 = vsel %vm67_vm0, %v2202_v35, 0  ;;  %3756 = vrot.lane.b32.xlu1 %v3747_v25, %s4386_s21  ;;  %3684 = vrot.lane.b32.xlu0 %v3678_v21, %s4386_s21  ;;  %v3660_v25 = vld [vmem:[%s5532_s0 + $0x1e] sm:$0x3f] }
 0x10a   :  { %4236 = vmatmul.mubr.msk.bf16.vlgmr.msra.gmra.mrb[56].mxu0 %vm63_vm1, %v4935_v40  ;;  %4237 = vmatprep.subr.msk.bf16.mxu1 %vm67_vm0, %v2203_v36  ;;  %v3971_v23 = vcombine.high %v3963_v18, %v3963_v18  ;;  %v4035_v31 = vrot.slane %v3660_v25, %v4414_v7  ;;  %v4028_v34 = vcombine.high %v3660_v25, %v3660_v25 }
 0x10b   :  { %2211 = vmatpush1.bf16.msra.mxu1 %v2205_v39  ;;  %v2291_v48 = vpop.permute.xlu1 %2290  ;;  %v2289_v49 = vpop.permute.xlu0 %2288  ;;  %2338 = vmatprep.mubr.bf16.mxu0 %v4379_v22 }
 0x10c   :  { %v2295_v59 = vsel %vm2294_vm6, %v2289_v49, %v2291_v48  ;;  %v4043_v44 = vcombine.high %v4035_v31, %v4035_v31 }
 0x10d   :  { %3760 = vrot.lane.b32.xlu1 %v3754_v41, %s4386_s21  ;;  %3758 = vrot.lane.b32.xlu0 %v3755_v42, %s4386_s21  ;;  %v2301_v3 = vsel %vm67_vm0, %v2295_v59, 0 }
 0x10e   :  { %4238 = vmatmul.mubr.msk.bf16.vlgmr.msra.gmra.mrb[56].mxu1 %vm63_vm1, %v4935_v40  ;;  %v3891_v40 = vrot.slane %v3658_v56, %v4414_v7 }
 0x10f   :  { %v2365_v60 = vpop.permute.xlu1 %2364  ;;  %v2293_v61 = vpop.permute.xlu0 %2292  ;;  %2410 = vmatprep.mubr.bf16.mxu1 %v4379_v22 }
 0x110   :  { %v2296_v62 = vsel %vm2294_vm6, %v2291_v48, %v2293_v61  ;;  %v3899_v17 = vcombine.high %v3891_v40, %v3891_v40 }
 0x111   :  { %3830 = vrot.lane.b32.xlu1 %v3827_v52, %s4386_s21  ;;  %3828 = vrot.lane.b32.xlu0 %v3819_v43, %s4386_s21  ;;  %v4042_v43 = vrot.slane %v4028_v34, %v4414_v7 }
 0x112   :  { %4240 = vmatprep.subr.msk.bf16.mxu0 %vm67_vm0, %v2296_v62 }
 0x113   :  { %2307 = vmatpush1.bf16.msra.mxu0 %v2301_v3  ;;  %v2369_v5 = vpop.permute.xlu1 %2368  ;;  %v2367_v6 = vpop.permute.xlu0 %2366  ;;  %v4252_v3 = vld [vmem:[%s5533_s1 + $0x18] sm:$0xf] }
 0x114   :  { %v2370_v10 = vsel %vm2294_vm6, %v2365_v60, %v2367_v6  ;;  %v2371_v11 = vsel %vm2294_vm6, %v2367_v6, %v2369_v5 }
 0x115   :  { %v2373_v14 = vsel %vm67_vm0, %v2370_v10, 0  ;;  %3900 = vrot.lane.b32.xlu1 %v3891_v40, %s4386_s21  ;;  %3832 = vrot.lane.b32.xlu0 %v3826_v1, %s4386_s21 }
 0x116   :  { %4241 = vmatmul.mubr.msk.bf16.vlgmr.msra.gmra.mrb[60].mxu0 %vm63_vm1, %v5054_v8  ;;  %4242 = vmatprep.subr.msk.bf16.mxu1 %vm67_vm0, %v2371_v11 }
 0x117   :  { %2379 = vmatpush1.bf16.msra.mxu1 %v2373_v14  ;;  %v2439_v19 = vpop.permute.xlu1 %2438  ;;  %v2437_v20 = vpop.permute.xlu0 %2436  ;;  %2482 = vmatprep.mubr.bf16.mxu0 %v4379_v22 }
 0x118   :  { %v2442_v21 = vsel %vm2294_vm6, %v2437_v20, %v2439_v19 }
 0x119   :  { %3904 = vrot.lane.b32.xlu1 %v3898_v16, %s4386_s21  ;;  %3902 = vrot.lane.b32.xlu0 %v3899_v17, %s4386_s21  ;;  %v2445_v35 = vsel %vm67_vm0, %v2442_v21, 0 }
 0x11a   :  { %4243 = vmatmul.mubr.msk.bf16.vlgmr.msra.gmra.mrb[60].mxu1 %vm63_vm1, %v5054_v8 }
 0x11b   :  { %v2509_v26 = vpop.permute.xlu1 %2508  ;;  %v2441_v27 = vpop.permute.xlu0 %2440  ;;  %2554 = vmatprep.mubr.bf16.mxu1 %v4379_v22 }
 0x11c   :  { %v2443_v30 = vsel %vm2294_vm6, %v2439_v19, %v2441_v27 }
 0x11d   :  { %3974 = vrot.lane.b32.xlu1 %v3971_v23, %s4386_s21  ;;  %3972 = vrot.lane.b32.xlu0 %v3963_v18, %s4386_s21 }
 0x11e   :  { %4244 = vmatprep.subr.msk.bf16.mxu0 %vm67_vm0, %v2443_v30 }
 0x11f   :  { %2451 = vmatpush1.bf16.msra.mxu0 %v2445_v35  ;;  %v2513_v36 = vpop.permute.xlu1 %2512  ;;  %v2511_v38 = vpop.permute.xlu0 %2510 }
 0x120   :  { %v2514_v39 = vsel %vm2294_vm6, %v2509_v26, %v2511_v38  ;;  %v2515_v41 = vsel %vm2294_vm6, %v2511_v38, %v2513_v36 }
 0x121   :  { %v2517_v42 = vsel %vm67_vm0, %v2514_v39, 0  ;;  %4044 = vrot.lane.b32.xlu1 %v4035_v31, %s4386_s21  ;;  %3976 = vrot.lane.b32.xlu0 %v3970_v33, %s4386_s21  ;;  %v5139_v31 = vand.u32 127, %v16_v0 }
 0x122   :  { %4245 = vmatmul.mubr.msk.bf16.vlgmr.msra.gmra.mrb[64].mxu0 %vm63_vm1, %v5054_v8  ;;  %4246 = vmatprep.subr.msk.bf16.mxu1 %vm67_vm0, %v2515_v41 }
 0x123   :  { %2523 = vmatpush1.bf16.msra.mxu1 %v2517_v42  ;;  %v2583_v45 = vpop.permute.xlu1 %2582  ;;  %v2581_v46 = vpop.permute.xlu0 %2580  ;;  %2626 = vmatprep.mubr.bf16.mxu0 %v4379_v22  ;;  %v5147_v39 = vadd.s32 128, %v5139_v31 }
 0x124   :  { %v2586_v48 = vsel %vm2294_vm6, %v2581_v46, %v2583_v45 }
 0x125   :  { %4048 = vrot.lane.b32.xlu1 %v4042_v43, %s4386_s21  ;;  %4046 = vrot.lane.b32.xlu0 %v4043_v44, %s4386_s21  ;;  %v2589_v53 = vsel %vm67_vm0, %v2586_v48, 0  ;;  %v23_v44 = vand.u32 15, %v5139_v31  ;;  %v30_v46 = vand.u32 15, %v5147_v39  ;;  %v5300_v31 = vld [vmem:[%s5533_s1 + $0x20] sm:$0xf] }
 0x126   :  { %4247 = vmatmul.mubr.msk.bf16.vlgmr.msra.gmra.mrb[64].mxu1 %vm63_vm1, %v5054_v8 }
 0x127   :  { %v2653_v7 = vpop.permute.xlu1 %2652  ;;  %v2585_v49 = vpop.permute.xlu0 %2584  ;;  %2698 = vmatprep.mubr.bf16.mxu1 %v4379_v22  ;;  %vm5159_vm9 = vcmp.ge.s32.totalorder %v23_v44, 1  ;;  %vm5166_vm10 = vcmp.ge.s32.totalorder %v30_v46, 1  ;;  %vm5284_vm12 = vcmp.lt.s32.totalorder %v23_v44, 15  ;;  %vm5291_vm13 = vcmp.lt.s32.totalorder %v30_v46, 15 }
 0x128   :  { %v2587_v52 = vsel %vm2294_vm6, %v2583_v45, %v2585_v49 }
 0x129   :  { %4248 = vmatprep.subr.msk.bf16.mxu0 %vm67_vm0, %v2587_v52 }
 0x12a   :  { %2595 = vmatpush1.bf16.msra.mxu0 %v2589_v53 }
 0x12b   :  { %v2657_v55 = vpop.permute.xlu1 %2656  ;;  %v2655_v56 = vpop.permute.xlu0 %2654 }
 0x12c   :  { %v2658_v57 = vsel %vm2294_vm6, %v2653_v7, %v2655_v56  ;;  %v2659_v58 = vsel %vm2294_vm6, %v2655_v56, %v2657_v55 }
 0x12d   :  { %v2661_v59 = vsel %vm67_vm0, %v2658_v57, 0  ;;  %4249 = vmatmul.mubr.msk.bf16.vlgmr.msra.gmra.mrb[68].mxu0 %vm63_vm1, %v5054_v8  ;;  %4250 = vmatprep.subr.msk.bf16.mxu1 %vm67_vm0, %v2659_v58  ;;  %v399_v57 = vsel %vm5159_vm9, %v4978_v9, 0.0  ;;  %v4123_v58 = vld [vmem:[%s5534_s2] sm:$0xff]  ;;  %v5187_v9 = vld [vmem:[%s5533_s1 + $0x1c] sm:$0xf]  ;;  %s4387_s1 = smov [#allocation2]  }
 0x12e   :  { %2667 = vmatpush1.bf16.msra.mxu1 %v2661_v59  ;;  %2806 = vmatprep.mubr.bf16.mxu0 %v4379_v22  ;;  %s4158_s11 = sshll.u32 %s4387_s1, 4  ;;  %s4159_s11 = int_to_ptr.vmem [resolvable:$true] %s4158_s11 }
 0x12f   :  { %v2759_v60 = vpop.permute.xlu1 %2758  ;;  %v2757_v61 = vpop.permute.xlu0 %2756  ;;  %4126 = vperm.xlu0 %4304, %v4123_v58   ;;  %s4353_s12 = scalar_lea.vmem %s4159_s11, 1536  ;;  %p4358_p1 = scmp.lt.s32.totalorder %s4159_s11, %s4159_s11 }
 0x130   :  { %v2763_v62 = vsel %vm2762_vm7, %v2757_v61, %v2759_v60  ;;  %p4354_p0 = scmp.ne.s32.totalorder %s4159_s11, %s4353_s12  ;;  %p4359_p2 = scmp.lt.s32.totalorder %s4353_s12, %s4353_s12 }
 0x131   :  { %4251 = vmatmul.mubr.msk.bf16.vlgmr.msra.gmra.mrb[68].mxu1 %vm63_vm1, %v5054_v8  ;;  %v2769_v2 = vsel %vm67_vm0, %v2763_v62, 0 }
 0x132   :  { %2878 = vmatprep.mubr.bf16.mxu1 %v4379_v22  ;;  %p4360_p3 = por %p4359_p2, %p4358_p1 }
 0x133   :  { %v2833_v63 = vpop.permute.xlu1 %2832  ;;  %v2761_v40 = vpop.permute.xlu0 %2760 }
 0x134   :  { %v2764_v1 = vsel %vm2762_vm7, %v2759_v60, %v2761_v40  ;;  %v400_v60 = vsel %vm5166_vm10, %v4984_v13, 0.0  ;;  %v401_v13 = vsel %vm5159_vm9, %v4982_v12, 0.0  ;;  %p4361_p4 = pnand %p4360_p3, %p4354_p0 }
 0x135   :  { %4253 = vmatprep.subr.msk.bf16.mxu0 %vm67_vm0, %v2764_v1 }
 0x136   :  { %2775 = vmatpush1.bf16.msra.mxu0 %v2769_v2 }
 0x137   :  { %v2837_v4 = vpop.permute.xlu1 %2836  ;;  %v2835_v5 = vpop.permute.xlu0 %2834 }
 0x138   :  { %v2838_v6 = vsel %vm2762_vm7, %v2833_v63, %v2835_v5  ;;  %v2839_v8 = vsel %vm2762_vm7, %v2835_v5, %v2837_v4 }
 0x139   :  { %v2841_v10 = vsel %vm67_vm0, %v2838_v6, 0  ;;  %4254 = vmatmul.mubr.msk.bf16.vlgmr.msra.gmra.mrb[72].mxu0 %vm63_vm1, %v4252_v3  ;;  %4255 = vmatprep.subr.msk.bf16.mxu1 %vm67_vm0, %v2839_v8  ;;  %v402_v6 = vsel %vm5166_vm10, %v4991_v15, 0.0 }
 0x13a   :  { %2847 = vmatpush1.bf16.msra.mxu1 %v2841_v10  ;;  %2950 = vmatprep.mubr.bf16.mxu0 %v4379_v22 }
 0x13b   :  { %v2907_v11 = vpop.permute.xlu1 %2906  ;;  %v2905_v14 = vpop.permute.xlu0 %2904 }
 0x13c   :  { %v2910_v16 = vsel %vm2762_vm7, %v2905_v14, %v2907_v11 }
 0x13d   :  { %4256 = vmatmul.mubr.msk.bf16.vlgmr.msra.gmra.mrb[72].mxu1 %vm63_vm1, %v4252_v3  ;;  %v2913_v20 = vsel %vm67_vm0, %v2910_v16, 0 }
 0x13e   :  { %3022 = vmatprep.mubr.bf16.mxu1 %v4379_v22 }
 0x13f   :  { %v2977_v17 = vpop.permute.xlu1 %2976  ;;  %v2909_v18 = vpop.permute.xlu0 %2908 }
 0x140   :  { %v2911_v19 = vsel %vm2762_vm7, %v2907_v11, %v2909_v18 }
 0x141   :  { %4257 = vmatprep.subr.msk.bf16.mxu0 %vm67_vm0, %v2911_v19 }
 0x142   :  { %2919 = vmatpush1.bf16.msra.mxu0 %v2913_v20 }
 0x143   :  { %v2981_v23 = vpop.permute.xlu1 %2980  ;;  %v2979_v24 = vpop.permute.xlu0 %2978 }
 0x144   :  { %v2982_v25 = vsel %vm2762_vm7, %v2977_v17, %v2979_v24  ;;  %v2983_v21 = vsel %vm2762_vm7, %v2979_v24, %v2981_v23 }
 0x145   :  { %v2985_v26 = vsel %vm67_vm0, %v2982_v25, 0  ;;  %4258 = vmatmul.mubr.msk.bf16.vlgmr.msra.gmra.mrb[76].mxu0 %vm63_vm1, %v4252_v3  ;;  %4259 = vmatprep.subr.msk.bf16.mxu1 %vm67_vm0, %v2983_v21  ;;  %v403_v21 = vsel %vm5159_vm9, %v5000_v29, 0.0  ;;  %v405_v29 = vsel %vm5159_vm9, %v5007_v28, 0.0 }
 0x146   :  { %2991 = vmatpush1.bf16.msra.mxu1 %v2985_v26  ;;  %3094 = vmatprep.mubr.bf16.mxu0 %v4379_v22 }
 0x147   :  { %v3051_v27 = vpop.permute.xlu1 %3050  ;;  %v3049_v30 = vpop.permute.xlu0 %3048 }
 0x148   :  { %v3054_v33 = vsel %vm2762_vm7, %v3049_v30, %v3051_v27 }
 0x149   :  { %4260 = vmatmul.mubr.msk.bf16.vlgmr.msra.gmra.mrb[76].mxu1 %vm63_vm1, %v4252_v3  ;;  %v3057_v38 = vsel %vm67_vm0, %v3054_v33, 0 }
 0x14a   :  { %3166 = vmatprep.mubr.bf16.mxu1 %v4379_v22 }
 0x14b   :  { %v3121_v34 = vpop.permute.xlu1 %3120  ;;  %v3053_v35 = vpop.permute.xlu0 %3052 }
 0x14c   :  { %v3055_v36 = vsel %vm2762_vm7, %v3051_v27, %v3053_v35  ;;  %v404_v27 = vsel %vm5166_vm10, %v5009_v32, 0.0 }
 0x14d   :  { %4261 = vmatprep.subr.msk.bf16.mxu0 %vm67_vm0, %v3055_v36 }
 0x14e   :  { %3063 = vmatpush1.bf16.msra.mxu0 %v3057_v38 }
 0x14f   :  { %v3125_v41 = vpop.permute.xlu1 %3124  ;;  %v3123_v42 = vpop.permute.xlu0 %3122 }
 0x150   :  { %v3126_v0 = vsel %vm2762_vm7, %v3121_v34, %v3123_v42  ;;  %v3127_v43 = vsel %vm2762_vm7, %v3123_v42, %v3125_v41 }
 0x151   :  { %v3129_v45 = vsel %vm67_vm0, %v3126_v0, 0  ;;  %4262 = vmatmul.mubr.msk.bf16.vlgmr.msra.gmra.mrb[80].mxu0 %vm63_vm1, %v4252_v3  ;;  %4263 = vmatprep.subr.msk.bf16.mxu1 %vm67_vm0, %v3127_v43  ;;  %v406_v0 = vsel %vm5166_vm10, %v5013_v37, 0.0 }
 0x152   :  { %3135 = vmatpush1.bf16.msra.mxu1 %v3129_v45  ;;  %3274 = vmatprep.mubr.bf16.mxu0 %v4379_v22 }
 0x153   :  { %v3227_v48 = vpop.permute.xlu1 %3226  ;;  %v3225_v7 = vpop.permute.xlu0 %3224 }
 0x154   :  { %v3231_v53 = vsel %vm3230_vm8, %v3225_v7, %v3227_v48 }
 0x155   :  { %4264 = vmatmul.mubr.msk.bf16.vlgmr.msra.gmra.mrb[80].mxu1 %vm63_vm1, %v4252_v3  ;;  %v3237_v61 = vsel %vm67_vm0, %v3231_v53, 0 }
 0x156   :  { %3346 = vmatprep.mubr.bf16.mxu1 %v4379_v22 }
 0x157   :  { %v3301_v55 = vpop.permute.xlu1 %3300  ;;  %v3229_v56 = vpop.permute.xlu0 %3228 }
 0x158   :  { %v3232_v59 = vsel %vm3230_vm8, %v3227_v48, %v3229_v56 }
 0x159   :  { %4266 = vmatprep.subr.msk.bf16.mxu0 %vm67_vm0, %v3232_v59  ;;  %v488_v62 = vpop.f32.mrb[12].mxu0 }
 0x15a   :  { %3243 = vmatpush1.bf16.msra.mxu0 %v3237_v61  ;;  %v5189_v63 = vadd.f32 %v488_v62, %v399_v57  ;;  %v490_v40 = vpop.f32.mrb[13].mxu0  ;;  %v407_v62 = vsel %vm5159_vm9, %v5023_v47, 0.0  ;;  %v409_v47 = vsel %vm5159_vm9, %v5026_v50, 0.0 }
 0x15b   :  { %v3305_v1 = vpop.permute.xlu1 %3304  ;;  %v3303_v2 = vpop.permute.xlu0 %3302  ;;  %v5194_v3 = vadd.f32 %v490_v40, %v400_v60 }
 0x15c   :  { %v3306_v4 = vsel %vm3230_vm8, %v3301_v55, %v3303_v2  ;;  %v3307_v5 = vsel %vm3230_vm8, %v3303_v2, %v3305_v1  ;;  %v492_v8 = vpop.f32.mrb[14].mxu0  ;;  %v408_v1 = vsel %vm5166_vm10, %v5028_v51, 0.0 }
 0x15d   :  { %v3309_v10 = vsel %vm67_vm0, %v3306_v4, 0  ;;  %4267 = vmatmul.mubr.msk.bf16.vlgmr.msra.gmra.mrb[84].mxu0 %vm63_vm1, %v5187_v9  ;;  %4268 = vmatprep.subr.msk.bf16.mxu1 %vm67_vm0, %v3307_v5  ;;  %v560_v11 = vpop.f32.mrb[12].mxu1  ;;  %v493_v12 = vpop.f32.mrb[15].mxu0 }
 0x15e   :  { %3315 = vmatpush1.bf16.msra.mxu1 %v3309_v10  ;;  %3418 = vmatprep.mubr.bf16.mxu0 %v4379_v22  ;;  %v5206_v14 = vadd.f32 %v560_v11, %v401_v13  ;;  %v562_v16 = vpop.f32.mrb[13].mxu1  ;;  %v410_v12 = vsel %vm5166_vm10, %v5032_v54, 0.0 }
 0x15f   :  { %v3375_v17 = vpop.permute.xlu1 %3374  ;;  %v3373_v18 = vpop.permute.xlu0 %3372  ;;  %v5208_v19 = vadd.f32 %v562_v16, %v402_v6 }
 0x160   :  { %v564_v15 = vpop.f32.mrb[14].mxu1  ;;  %v3378_v23 = vsel %vm3230_vm8, %v3373_v18, %v3375_v17 }
 0x161   :  { %4269 = vmatmul.mubr.msk.bf16.vlgmr.msra.gmra.mrb[84].mxu1 %vm63_vm1, %v5187_v9  ;;  %v565_v20 = vpop.f32.mrb[15].mxu1  ;;  %v3381_v30 = vsel %vm67_vm0, %v3378_v23, 0 }
 0x162   :  { %3490 = vmatprep.mubr.bf16.mxu1 %v4379_v22 }
 0x163   :  { %v3445_v24 = vpop.permute.xlu1 %3444  ;;  %v3377_v25 = vpop.permute.xlu0 %3376 }
 0x164   :  { %v3379_v26 = vsel %vm3230_vm8, %v3375_v17, %v3377_v25 }
 0x165   :  { %4270 = vmatprep.subr.msk.bf16.mxu0 %vm67_vm0, %v3379_v26  ;;  %v632_v33 = vpop.f32.mrb[16].mxu0 }
 0x166   :  { %3387 = vmatpush1.bf16.msra.mxu0 %v3381_v30  ;;  %v5223_v34 = vadd.f32 %v632_v33, %v403_v21  ;;  %v634_v35 = vpop.f32.mrb[17].mxu0 }
 0x167   :  { %v3449_v36 = vpop.permute.xlu1 %3448  ;;  %v3447_v38 = vpop.permute.xlu0 %3446  ;;  %v5228_v41 = vadd.f32 %v634_v35, %v404_v27 }
 0x168   :  { %v3450_v42 = vsel %vm3230_vm8, %v3445_v24, %v3447_v38  ;;  %v3451_v32 = vsel %vm3230_vm8, %v3447_v38, %v3449_v36  ;;  %v636_v43 = vpop.f32.mrb[18].mxu0 }
 0x169   :  { %v3453_v45 = vsel %vm67_vm0, %v3450_v42, 0  ;;  %4271 = vmatmul.mubr.msk.bf16.vlgmr.msra.gmra.mrb[88].mxu0 %vm63_vm1, %v5187_v9  ;;  %4272 = vmatprep.subr.msk.bf16.mxu1 %vm67_vm0, %v3451_v32  ;;  %v704_v48 = vpop.f32.mrb[16].mxu1  ;;  %v637_v28 = vpop.f32.mrb[19].mxu0 }
 0x16a   :  { %3459 = vmatpush1.bf16.msra.mxu1 %v3453_v45  ;;  %3562 = vmatprep.mubr.bf16.mxu0 %v4379_v22  ;;  %v5240_v7 = vadd.f32 %v704_v48, %v405_v29  ;;  %v706_v53 = vpop.f32.mrb[17].mxu1 }
 0x16b   :  { %v3519_v55 = vpop.permute.xlu1 %3518  ;;  %v3517_v56 = vpop.permute.xlu0 %3516  ;;  %v5242_v57 = vadd.f32 %v706_v53, %v406_v0 }
 0x16c   :  { %v708_v37 = vpop.f32.mrb[18].mxu1  ;;  %v3522_v59 = vsel %vm3230_vm8, %v3517_v56, %v3519_v55 }
 0x16d   :  { %4273 = vmatmul.mubr.msk.bf16.vlgmr.msra.gmra.mrb[88].mxu1 %vm63_vm1, %v5187_v9  ;;  %v709_v58 = vpop.f32.mrb[19].mxu1  ;;  %v3525_v2 = vsel %vm67_vm0, %v3522_v59, 0 }
 0x16e   :  { %3634 = vmatprep.mubr.bf16.mxu1 %v4379_v22 }
 0x16f   :  { %v3589_v60 = vpop.permute.xlu1 %3588  ;;  %v3521_v61 = vpop.permute.xlu0 %3520 }
 0x170   :  { %v3523_v40 = vsel %vm3230_vm8, %v3519_v55, %v3521_v61 }
 0x171   :  { %4274 = vmatprep.subr.msk.bf16.mxu0 %vm67_vm0, %v3523_v40  ;;  %v776_v13 = vpop.f32.mrb[20].mxu0 }
 0x172   :  { %3531 = vmatpush1.bf16.msra.mxu0 %v3525_v2  ;;  %v5257_v4 = vadd.f32 %v776_v13, %v407_v62  ;;  %v778_v5 = vpop.f32.mrb[21].mxu0 }
 0x173   :  { %v3593_v6 = vpop.permute.xlu1 %3592  ;;  %v3591_v8 = vpop.permute.xlu0 %3590  ;;  %v5262_v10 = vadd.f32 %v778_v5, %v408_v1 }
 0x174   :  { %v3594_v11 = vsel %vm3230_vm8, %v3589_v60, %v3591_v8  ;;  %v3595_v51 = vsel %vm3230_vm8, %v3591_v8, %v3593_v6  ;;  %v780_v16 = vpop.f32.mrb[22].mxu0 }
 0x175   :  { %v3597_v17 = vsel %vm67_vm0, %v3594_v11, 0  ;;  %4275 = vmatmul.mubr.msk.bf16.vlgmr.msra.gmra.mrb[92].mxu0 %vm63_vm1, %v5187_v9  ;;  %4276 = vmatprep.subr.msk.bf16.mxu1 %vm67_vm0, %v3595_v51  ;;  %v848_v18 = vpop.f32.mrb[20].mxu1  ;;  %v781_v50 = vpop.f32.mrb[23].mxu0 }
 0x176   :  { %3603 = vmatpush1.bf16.msra.mxu1 %v3597_v17  ;;  %3730 = vmatprep.mubr.bf16.mxu0 %v4379_v22  ;;  %v5274_v15 = vadd.f32 %v848_v18, %v409_v47  ;;  %v850_v20 = vpop.f32.mrb[21].mxu1 }
 0x177   :  { %v3683_v23 = vpop.permute.xlu1 %3682  ;;  %v3681_v24 = vpop.permute.xlu0 %3680  ;;  %v5276_v54 = vadd.f32 %v850_v20, %v410_v12 }
 0x178   :  { %v852_v25 = vpop.f32.mrb[22].mxu1  ;;  %v3687_v26 = vsel %vm3686_vm11, %v3681_v24, %v3683_v23 }
 0x179   :  { %4277 = vmatmul.mubr.msk.bf16.vlgmr.msra.gmra.mrb[92].mxu1 %vm63_vm1, %v5187_v9  ;;  %v853_v21 = vpop.f32.mrb[23].mxu1  ;;  %v3693_v9 = vsel %vm67_vm0, %v3687_v26, 0 }
 0x17a   :  { %3802 = vmatprep.mubr.bf16.mxu1 %v4379_v22 }
 0x17b   :  { %v3757_v27 = vpop.permute.xlu1 %3756  ;;  %v3685_v30 = vpop.permute.xlu0 %3684 }
 0x17c   :  { %v3688_v35 = vsel %vm3686_vm11, %v3683_v23, %v3685_v30 }
 0x17d   :  { %4279 = vmatprep.subr.msk.bf16.mxu0 %vm67_vm0, %v3688_v35  ;;  %v944_v38 = vpop.f32.mrb[24].mxu0 }
 0x17e   :  { %3699 = vmatpush1.bf16.msra.mxu0 %v3693_v9  ;;  %v1315_v44 = vsel %vm5284_vm12, %v944_v38, 0.0  ;;  %v946_v29 = vpop.f32.mrb[25].mxu0 }
 0x17f   :  { %v3761_v39 = vpop.permute.xlu1 %3760  ;;  %v3759_v46 = vpop.permute.xlu0 %3758  ;;  %v5305_v42 = vadd.f32 %v1315_v44, %v5189_v63  ;;  %v1316_v32 = vsel %vm5291_vm13, %v946_v29, 0.0 }
 0x180   :  { %v3762_v0 = vsel %vm3686_vm11, %v3757_v27, %v3759_v46  ;;  %v3763_v43 = vsel %vm3686_vm11, %v3759_v46, %v3761_v39  ;;  %v5312_v45 = vadd.f32 %v1316_v32, %v5194_v3  ;;  %v948_v48 = vpop.f32.mrb[26].mxu0 }
 0x181   :  { %v3765_v28 = vsel %vm67_vm0, %v3762_v0, 0  ;;  %4280 = vmatmul.mubr.msk.bf16.vlgmr.msra.gmra.mrb[96].mxu0 %vm63_vm1, %v5300_v31  ;;  %4281 = vmatprep.subr.msk.bf16.mxu1 %vm67_vm0, %v3763_v43  ;;  %v1016_v63 = vpop.f32.mrb[24].mxu1  ;;  %v949_v53 = vpop.f32.mrb[27].mxu0 }
 0x182   :  { %3771 = vmatpush1.bf16.msra.mxu1 %v3765_v28  ;;  %3874 = vmatprep.mubr.bf16.mxu0 %v4379_v22  ;;  %v1317_v55 = vsel %vm5284_vm12, %v1016_v63, 0.0  ;;  %v1018_v56 = vpop.f32.mrb[25].mxu1 }
 0x183   :  { %v3831_v37 = vpop.permute.xlu1 %3830  ;;  %v3829_v3 = vpop.permute.xlu0 %3828  ;;  %v5322_v58 = vadd.f32 %v1317_v55, %v5206_v14  ;;  %v1318_v59 = vsel %vm5291_vm13, %v1018_v56, 0.0 }
 0x184   :  { %v5327_v60 = vadd.f32 %v1318_v59, %v5208_v19  ;;  %v1020_v61 = vpop.f32.mrb[26].mxu1  ;;  %v3834_v40 = vsel %vm3686_vm11, %v3829_v3, %v3831_v37 }
 0x185   :  { %4282 = vmatmul.mubr.msk.bf16.vlgmr.msra.gmra.mrb[96].mxu1 %vm63_vm1, %v5300_v31  ;;  %v1021_v62 = vpop.f32.mrb[27].mxu1  ;;  %v3837_v13 = vsel %vm67_vm0, %v3834_v40, 0 }
 0x186   :  { %3946 = vmatprep.mubr.bf16.mxu1 %v4379_v22 }
 0x187   :  { %v3901_v1 = vpop.permute.xlu1 %3900  ;;  %v3833_v2 = vpop.permute.xlu0 %3832 }
 0x188   :  { %v3835_v14 = vsel %vm3686_vm11, %v3831_v37, %v3833_v2 }
 0x189   :  { %4283 = vmatprep.subr.msk.bf16.mxu0 %vm67_vm0, %v3835_v14  ;;  %v1088_v5 = vpop.f32.mrb[28].mxu0 }
 0x18a   :  { %3843 = vmatpush1.bf16.msra.mxu0 %v3837_v13  ;;  %v1319_v19 = vsel %vm5284_vm12, %v1088_v5, 0.0  ;;  %v1090_v6 = vpop.f32.mrb[29].mxu0 }
 0x18b   :  { %v3905_v8 = vpop.permute.xlu1 %3904  ;;  %v3903_v47 = vpop.permute.xlu0 %3902  ;;  %v5339_v11 = vadd.f32 %v1319_v19, %v5223_v34  ;;  %v1320_v51 = vsel %vm5291_vm13, %v1090_v6, 0.0 }
 0x18c   :  { %v3906_v12 = vsel %vm3686_vm11, %v3901_v1, %v3903_v47  ;;  %v3907_v16 = vsel %vm3686_vm11, %v3903_v47, %v3905_v8  ;;  %v5346_v17 = vadd.f32 %v1320_v51, %v5228_v41  ;;  %v1092_v18 = vpop.f32.mrb[30].mxu0 }
 0x18d   :  { %v3909_v50 = vsel %vm67_vm0, %v3906_v12, 0  ;;  %4284 = vmatmul.mubr.msk.bf16.vlgmr.msra.gmra.mrb[100].mxu0 %vm63_vm1, %v5300_v31  ;;  %4285 = vmatprep.subr.msk.bf16.mxu1 %vm67_vm0, %v3907_v16  ;;  %v1160_v34 = vpop.f32.mrb[28].mxu1  ;;  %v1093_v20 = vpop.f32.mrb[31].mxu0 }
 0x18e   :  { %3915 = vmatpush1.bf16.msra.mxu1 %v3909_v50  ;;  %4018 = vmatprep.mubr.bf16.mxu0 %v4379_v22  ;;  %v1321_v23 = vsel %vm5284_vm12, %v1160_v34, 0.0  ;;  %v1162_v24 = vpop.f32.mrb[29].mxu1 }
 0x18f   :  { %v3975_v25 = vpop.permute.xlu1 %3974  ;;  %v3973_v41 = vpop.permute.xlu0 %3972  ;;  %v5356_v21 = vadd.f32 %v1321_v23, %v5240_v7  ;;  %v1322_v26 = vsel %vm5291_vm13, %v1162_v24, 0.0 }
 0x190   :  { %v5361_v27 = vadd.f32 %v1322_v26, %v5242_v57  ;;  %v1164_v30 = vpop.f32.mrb[30].mxu1  ;;  %v3978_v9 = vsel %vm3686_vm11, %v3973_v41, %v3975_v25 }
 0x191   :  { %4286 = vmatmul.mubr.msk.bf16.vlgmr.msra.gmra.mrb[100].mxu1 %vm63_vm1, %v5300_v31  ;;  %v1165_v35 = vpop.f32.mrb[31].mxu1  ;;  %v3981_v29 = vsel %vm67_vm0, %v3978_v9, 0 }
 0x192   :  { %4090 = vmatprep.mubr.bf16.mxu1 %v4379_v22 }
 0x193   :  { %v4045_v38 = vpop.permute.xlu1 %4044  ;;  %v3977_v44 = vpop.permute.xlu0 %3976 }
 0x194   :  { %v3979_v7 = vsel %vm3686_vm11, %v3975_v25, %v3977_v44 }
 0x195   :  { %4287 = vmatprep.subr.msk.bf16.mxu0 %vm67_vm0, %v3979_v7  ;;  %v1232_v39 = vpop.f32.mrb[32].mxu0 }
 0x196   :  { %3987 = vmatpush1.bf16.msra.mxu0 %v3981_v29  ;;  %v1323_v57 = vsel %vm5284_vm12, %v1232_v39, 0.0  ;;  %v1234_v46 = vpop.f32.mrb[33].mxu0 }
 0x197   :  { %v4049_v32 = vpop.permute.xlu1 %4048  ;;  %v4047_v0 = vpop.permute.xlu0 %4046  ;;  %v1335_v43 = vadd.f32 %v1323_v57, %v5257_v4  ;;  %v1324_v22 = vsel %vm5291_vm13, %v1234_v46, 0.0 }
 0x198   :  { %v4050_v48 = vsel %vm3686_vm11, %v4045_v38, %v4047_v0  ;;  %v4051_v28 = vsel %vm3686_vm11, %v4047_v0, %v4049_v32  ;;  %v1336_v63 = vadd.f32 %v1324_v22, %v5262_v10  ;;  %v1236_v53 = vpop.f32.mrb[34].mxu0 }
 0x199   :  { %v4053_v55 = vsel %vm67_vm0, %v4050_v48, 0  ;;  %4288 = vmatmul.mubr.msk.bf16.vlgmr.msra.gmra.mrb[104].mxu0 %vm63_vm1, %v5300_v31  ;;  %4289 = vmatprep.subr.msk.bf16.mxu1 %vm67_vm0, %v4051_v28  ;;  %v1304_v56 = vpop.f32.mrb[32].mxu1  ;;  %v1237_v37 = vpop.f32.mrb[35].mxu0 }
 0x19a   :  { %4059 = vmatpush1.bf16.msra.mxu1 %v4053_v55  ;;  %v1325_v4 = vsel %vm5284_vm12, %v1304_v56, 0.0  ;;  %v1306_v3 = vpop.f32.mrb[33].mxu1 }
 0x19b   :  { %v1337_v59 = vadd.f32 %v1325_v4, %v5274_v15  ;;  %v1326_v10 = vsel %vm5291_vm13, %v1306_v3, 0.0  ;;  %v1308_v61 = vpop.f32.mrb[34].mxu1 }
 0x19c   :  { %v1338_v62 = vadd.f32 %v1326_v10, %v5276_v54  ;;  %v1309_v40 = vpop.f32.mrb[35].mxu1 }
 0x19d   :  { %4290 = vmatmul.mubr.msk.bf16.vlgmr.msra.gmra.mrb[104].mxu1 %vm63_vm1, %v5300_v31 }
 0x1a1   :  { %v1416_v1 = vpop.f32.mrb[36].mxu0 }
 0x1a2   :  { %v1783_v2 = vsel %vm5159_vm9, %v1416_v1, 0.0  ;;  %v1418_v14 = vpop.f32.mrb[37].mxu0 }
 0x1a3   :  { %v1795_v13 = vadd.f32 %v1783_v2, %v5305_v42  ;;  %v1784_v15 = vsel %vm5166_vm10, %v1418_v14, 0.0  ;;  %v1420_v5 = vpop.f32.mrb[38].mxu0 }
 0x1a4   :  { %v1796_v19 = vadd.f32 %v1784_v15, %v5312_v45  ;;  %v1421_v6 = vpop.f32.mrb[39].mxu0 }
 0x1a5   :  { %v1488_v8 = vpop.f32.mrb[36].mxu1 }
 0x1a6   :  { %v1785_v54 = vsel %vm5159_vm9, %v1488_v8, 0.0  ;;  %v1490_v47 = vpop.f32.mrb[37].mxu1 }
 0x1a7   :  { %v1797_v31 = vadd.f32 %v1785_v54, %v5322_v58  ;;  %v1786_v51 = vsel %vm5166_vm10, %v1490_v47, 0.0  ;;  %v1492_v12 = vpop.f32.mrb[38].mxu1 }
 0x1a8   :  { %v1798_v42 = vadd.f32 %v1786_v51, %v5327_v60  ;;  %v1493_v16 = vpop.f32.mrb[39].mxu1 }
 0x1ad   :  { %v1560_v18 = vpop.f32.mrb[40].mxu0 }
 0x1ae   :  { %v1787_v50 = vsel %vm5159_vm9, %v1560_v18, 0.0  ;;  %v1562_v45 = vpop.f32.mrb[41].mxu0 }
 0x1af   :  { %v1799_v34 = vadd.f32 %v1787_v50, %v5339_v11  ;;  %v1788_v20 = vsel %vm5166_vm10, %v1562_v45, 0.0  ;;  %v1564_v23 = vpop.f32.mrb[42].mxu0 }
 0x1b0   :  { %v1800_v58 = vadd.f32 %v1788_v20, %v5346_v17  ;;  %v1565_v24 = vpop.f32.mrb[43].mxu0 }
 0x1b1   :  { %v1632_v25 = vpop.f32.mrb[40].mxu1 }
 0x1b2   :  { %v1789_v41 = vsel %vm5159_vm9, %v1632_v25, 0.0  ;;  %v1634_v60 = vpop.f32.mrb[41].mxu1 }
 0x1b3   :  { %v1801_v26 = vadd.f32 %v1789_v41, %v5356_v21  ;;  %v1790_v30 = vsel %vm5166_vm10, %v1634_v60, 0.0  ;;  %v1636_v35 = vpop.f32.mrb[42].mxu1 }
 0x1b4   :  { %v1802_v11 = vadd.f32 %v1790_v30, %v5361_v27  ;;  %v1637_v9 = vpop.f32.mrb[43].mxu1 }
 0x1b9   :  { %v1704_v38 = vpop.f32.mrb[44].mxu0 }
 0x1ba   :  { %v1791_v44 = vsel %vm5159_vm9, %v1704_v38, 0.0  ;;  %v1706_v17 = vpop.f32.mrb[45].mxu0 }
 0x1bb   :  { %v1803_v7 = vadd.f32 %v1791_v44, %v1335_v43  ;;  %v1792_v29 = vsel %vm5166_vm10, %v1706_v17, 0.0  ;;  %v1708_v39 = vpop.f32.mrb[46].mxu0 }
 0x1bc   :  { %v1804_v57 = vadd.f32 %v1792_v29, %v1336_v63  ;;  %v1709_v46 = vpop.f32.mrb[47].mxu0 }
 0x1bd   :  { %v1776_v21 = vpop.f32.mrb[44].mxu1 }
 0x1be   :  { %v1793_v32 = vsel %vm5159_vm9, %v1776_v21, 0.0  ;;  %v1778_v0 = vpop.f32.mrb[45].mxu1 }
 0x1bf   :  { %v1805_v22 = vadd.f32 %v1793_v32, %v1337_v59  ;;  %v1794_v27 = vsel %vm5166_vm10, %v1778_v0, 0.0  ;;  %v1780_v48 = vpop.f32.mrb[46].mxu1 }
 0x1c0   :  { %v1806_v28 = vadd.f32 %v1794_v27, %v1338_v62  ;;  %v1781_v53 = vpop.f32.mrb[47].mxu1 }
 0x1c5   :  { %v1884_v55 = vpop.f32.mrb[48].mxu0 }
 0x1c6   :  { %v2251_v43 = vadd.f32 %v1884_v55, %v1795_v13  ;;  %v1886_v56 = vpop.f32.mrb[49].mxu0 }
 0x1c7   :  { %v2252_v37 = vadd.f32 %v1886_v56, %v1796_v19  ;;  %v1888_v4 = vpop.f32.mrb[50].mxu0 }
 0x1c8   :  { %v1889_v3 = vpop.f32.mrb[51].mxu0 }
 0x1c9   :  { %v1956_v63 = vpop.f32.mrb[48].mxu1 }
 0x1ca   :  { %v2253_v10 = vadd.f32 %v1956_v63, %v1797_v31  ;;  %v1958_v61 = vpop.f32.mrb[49].mxu1 }
 0x1cb   :  { %v2254_v40 = vadd.f32 %v1958_v61, %v1798_v42  ;;  %v1960_v1 = vpop.f32.mrb[50].mxu1 }
 0x1cc   :  { %v1961_v2 = vpop.f32.mrb[51].mxu1 }
 0x1d1   :  { %v2028_v14 = vpop.f32.mrb[52].mxu0 }
 0x1d2   :  { %v2255_v59 = vadd.f32 %v2028_v14, %v1799_v34  ;;  %v2030_v15 = vpop.f32.mrb[53].mxu0 }
 0x1d3   :  { %v2256_v5 = vadd.f32 %v2030_v15, %v1800_v58  ;;  %v2032_v6 = vpop.f32.mrb[54].mxu0 }
 0x1d4   :  { %v2033_v8 = vpop.f32.mrb[55].mxu0 }
 0x1d5   :  { %v2100_v62 = vpop.f32.mrb[52].mxu1 }
 0x1d6   :  { %v2257_v54 = vadd.f32 %v2100_v62, %v1801_v26  ;;  %v2102_v47 = vpop.f32.mrb[53].mxu1 }
 0x1d7   :  { %v2258_v13 = vadd.f32 %v2102_v47, %v1802_v11  ;;  %v2104_v51 = vpop.f32.mrb[54].mxu1 }
 0x1d8   :  { %v2105_v19 = vpop.f32.mrb[55].mxu1 }
 0x1dd   :  { %v2172_v12 = vpop.f32.mrb[56].mxu0 }
 0x1de   :  { %v2259_v16 = vadd.f32 %v2172_v12, %v1803_v7  ;;  %v2174_v18 = vpop.f32.mrb[57].mxu0 }
 0x1df   :  { %v2260_v31 = vadd.f32 %v2174_v18, %v1804_v57  ;;  %v2176_v50 = vpop.f32.mrb[58].mxu0 }
 0x1e0   :  { %v2177_v42 = vpop.f32.mrb[59].mxu0 }
 0x1e1   :  { %v2244_v45 = vpop.f32.mrb[56].mxu1 }
 0x1e2   :  { %v2261_v20 = vadd.f32 %v2244_v45, %v1805_v22  ;;  %v2246_v23 = vpop.f32.mrb[57].mxu1 }
 0x1e3   :  { %v2262_v34 = vadd.f32 %v2246_v23, %v1806_v28  ;;  %v2248_v24 = vpop.f32.mrb[58].mxu1 }
 0x1e4   :  { %v2249_v58 = vpop.f32.mrb[59].mxu1 }
 0x1e9   :  { %v2340_v25 = vpop.f32.mrb[60].mxu0 }
 0x1ea   :  { %v2707_v41 = vsel %vm5284_vm12, %v2340_v25, 0.0  ;;  %v2342_v60 = vpop.f32.mrb[61].mxu0 }
 0x1eb   :  { %v2719_v26 = vadd.f32 %v2707_v41, %v2251_v43  ;;  %v2708_v30 = vsel %vm5291_vm13, %v2342_v60, 0.0  ;;  %v2344_v35 = vpop.f32.mrb[62].mxu0 }
 0x1ec   :  { %v2720_v11 = vadd.f32 %v2708_v30, %v2252_v37  ;;  %v2345_v9 = vpop.f32.mrb[63].mxu0 }
 0x1ed   :  { %v2412_v38 = vpop.f32.mrb[60].mxu1 }
 0x1ee   :  { %v2709_v44 = vsel %vm5284_vm12, %v2412_v38, 0.0  ;;  %v2414_v17 = vpop.f32.mrb[61].mxu1 }
 0x1ef   :  { %v2721_v7 = vadd.f32 %v2709_v44, %v2253_v10  ;;  %v2710_v29 = vsel %vm5291_vm13, %v2414_v17, 0.0  ;;  %v2416_v39 = vpop.f32.mrb[62].mxu1 }
 0x1f0   :  { %v2722_v57 = vadd.f32 %v2710_v29, %v2254_v40  ;;  %v2417_v46 = vpop.f32.mrb[63].mxu1 }
 0x1f5   :  { %v2484_v21 = vpop.f32.mrb[64].mxu0 }
 0x1f6   :  { %v2711_v32 = vsel %vm5284_vm12, %v2484_v21, 0.0  ;;  %v2486_v0 = vpop.f32.mrb[65].mxu0 }
 0x1f7   :  { %v2723_v22 = vadd.f32 %v2711_v32, %v2255_v59  ;;  %v2712_v27 = vsel %vm5291_vm13, %v2486_v0, 0.0  ;;  %v2488_v48 = vpop.f32.mrb[66].mxu0 }
 0x1f8   :  { %v2724_v28 = vadd.f32 %v2712_v27, %v2256_v5  ;;  %v2489_v53 = vpop.f32.mrb[67].mxu0 }
 0x1f9   :  { %v2556_v55 = vpop.f32.mrb[64].mxu1 }
 0x1fa   :  { %v2713_v43 = vsel %vm5284_vm12, %v2556_v55, 0.0  ;;  %v2558_v56 = vpop.f32.mrb[65].mxu1 }
 0x1fb   :  { %v2725_v37 = vadd.f32 %v2713_v43, %v2257_v54  ;;  %v2714_v4 = vsel %vm5291_vm13, %v2558_v56, 0.0  ;;  %v2560_v3 = vpop.f32.mrb[66].mxu1 }
 0x1fc   :  { %v2726_v63 = vadd.f32 %v2714_v4, %v2258_v13  ;;  %v2561_v10 = vpop.f32.mrb[67].mxu1 }
 0x200   :  { %v2628_v61 = vpop.f32.mrb[68].mxu0 }
 0x201   :  { %v2715_v40 = vsel %vm5284_vm12, %v2628_v61, 0.0  ;;  %v2630_v1 = vpop.f32.mrb[69].mxu0 }
 0x202   :  { %v2727_v2 = vadd.f32 %v2715_v40, %v2259_v16  ;;  %v2716_v14 = vsel %vm5291_vm13, %v2630_v1, 0.0  ;;  %v2632_v59 = vpop.f32.mrb[70].mxu0 }
 0x203   :  { %v2728_v15 = vadd.f32 %v2716_v14, %v2260_v31  ;;  %v2633_v5 = vpop.f32.mrb[71].mxu0 }
 0x204   :  { %v2700_v6 = vpop.f32.mrb[68].mxu1 }
 0x205   :  { %v2717_v8 = vsel %vm5284_vm12, %v2700_v6, 0.0  ;;  %v2702_v62 = vpop.f32.mrb[69].mxu1 }
 0x206   :  { %v2729_v54 = vadd.f32 %v2717_v8, %v2261_v20  ;;  %v2718_v47 = vsel %vm5291_vm13, %v2702_v62, 0.0  ;;  %v2704_v13 = vpop.f32.mrb[70].mxu1 }
 0x207   :  { %v2730_v51 = vadd.f32 %v2718_v47, %v2262_v34  ;;  %v2705_v19 = vpop.f32.mrb[71].mxu1 }
 0x20c   :  { %v2808_v12 = vpop.f32.mrb[72].mxu0 }
 0x20d   :  { %v3175_v16 = vsel %vm5159_vm9, %v2808_v12, 0.0  ;;  %v2810_v18 = vpop.f32.mrb[73].mxu0 }
 0x20e   :  { %v3187_v50 = vadd.f32 %v3175_v16, %v2719_v26  ;;  %v3176_v31 = vsel %vm5166_vm10, %v2810_v18, 0.0  ;;  %v2812_v42 = vpop.f32.mrb[74].mxu0 }
 0x20f   :  { %v3188_v45 = vadd.f32 %v3176_v31, %v2720_v11  ;;  %v2813_v23 = vpop.f32.mrb[75].mxu0 }
 0x210   :  { %v2880_v24 = vpop.f32.mrb[72].mxu1 }
 0x211   :  { %v3177_v20 = vsel %vm5159_vm9, %v2880_v24, 0.0  ;;  %v2882_v58 = vpop.f32.mrb[73].mxu1 }
 0x212   :  { %v3189_v25 = vadd.f32 %v3177_v20, %v2721_v7  ;;  %v3178_v34 = vsel %vm5166_vm10, %v2882_v58, 0.0  ;;  %v2884_v41 = vpop.f32.mrb[74].mxu1 }
 0x213   :  { %v3190_v60 = vadd.f32 %v3178_v34, %v2722_v57  ;;  %v2885_v30 = vpop.f32.mrb[75].mxu1 }
 0x218   :  { %v2952_v35 = vpop.f32.mrb[76].mxu0 }
 0x219   :  { %v3179_v26 = vsel %vm5159_vm9, %v2952_v35, 0.0  ;;  %v2954_v9 = vpop.f32.mrb[77].mxu0 }
 0x21a   :  { %v3191_v38 = vadd.f32 %v3179_v26, %v2723_v22  ;;  %v3180_v11 = vsel %vm5166_vm10, %v2954_v9, 0.0  ;;  %v2956_v44 = vpop.f32.mrb[78].mxu0 }
 0x21b   :  { %v3192_v17 = vadd.f32 %v3180_v11, %v2724_v28  ;;  %v2957_v29 = vpop.f32.mrb[79].mxu0 }
 0x21c   :  { %v3024_v39 = vpop.f32.mrb[76].mxu1 }
 0x21d   :  { %v3181_v7 = vsel %vm5159_vm9, %v3024_v39, 0.0  ;;  %v3026_v46 = vpop.f32.mrb[77].mxu1 }
 0x21e   :  { %v3193_v21 = vadd.f32 %v3181_v7, %v2725_v37  ;;  %v3182_v57 = vsel %vm5166_vm10, %v3026_v46, 0.0  ;;  %v3028_v32 = vpop.f32.mrb[78].mxu1  ;;  %v5480_v7 = vpop.permute.xlu0 %4126 }
 0x21f   :  { %v3194_v0 = vadd.f32 %v3182_v57, %v2726_v63  ;;  %v3029_v27 = vpop.f32.mrb[79].mxu1 }
 0x224   :  { %v3096_v48 = vpop.f32.mrb[80].mxu0 }
 0x225   :  { %v3183_v22 = vsel %vm5159_vm9, %v3096_v48, 0.0  ;;  %v3098_v53 = vpop.f32.mrb[81].mxu0 }
 0x226   :  { %v3195_v55 = vadd.f32 %v3183_v22, %v2727_v2  ;;  %v3184_v28 = vsel %vm5166_vm10, %v3098_v53, 0.0  ;;  %v3100_v43 = vpop.f32.mrb[82].mxu0 }
 0x227   :  { %v3196_v56 = vadd.f32 %v3184_v28, %v2728_v15  ;;  %v3101_v4 = vpop.f32.mrb[83].mxu0 }
 0x228   :  { %v3168_v3 = vpop.f32.mrb[80].mxu1 }
 0x229   :  { %v3185_v37 = vsel %vm5159_vm9, %v3168_v3, 0.0  ;;  %v3170_v10 = vpop.f32.mrb[81].mxu1 }
 0x22a   :  { %v3197_v61 = vadd.f32 %v3185_v37, %v2729_v54  ;;  %v3186_v63 = vsel %vm5166_vm10, %v3170_v10, 0.0  ;;  %v3172_v40 = vpop.f32.mrb[82].mxu1 }
 0x22b   :  { %v3198_v1 = vadd.f32 %v3186_v63, %v2730_v51  ;;  %v3173_v14 = vpop.f32.mrb[83].mxu1 }
 0x230   :  { %v3276_v59 = vpop.f32.mrb[84].mxu0 }
 0x231   :  { %v3643_v2 = vadd.f32 %v3276_v59, %v3187_v50  ;;  %v3278_v5 = vpop.f32.mrb[85].mxu0 }
 0x232   :  { %v3644_v6 = vadd.f32 %v3278_v5, %v3188_v45  ;;  %v3280_v8 = vpop.f32.mrb[86].mxu0 }
 0x233   :  { %v3281_v62 = vpop.f32.mrb[87].mxu0 }
 0x234   :  { %v3348_v15 = vpop.f32.mrb[84].mxu1 }
 0x235   :  { %v3645_v47 = vadd.f32 %v3348_v15, %v3189_v25  ;;  %v3350_v13 = vpop.f32.mrb[85].mxu1 }
 0x236   :  { %v3646_v19 = vadd.f32 %v3350_v13, %v3190_v60  ;;  %v3352_v49 = vpop.f32.mrb[86].mxu1 }
 0x237   :  { %v3353_v12 = vpop.f32.mrb[87].mxu1 }
 0x23c   :  { %v3420_v16 = vpop.f32.mrb[88].mxu0 }
 0x23d   :  { %v3647_v54 = vadd.f32 %v3420_v16, %v3191_v38  ;;  %v3422_v18 = vpop.f32.mrb[89].mxu0 }
 0x23e   :  { %v3648_v52 = vadd.f32 %v3422_v18, %v3192_v17  ;;  %v3424_v31 = vpop.f32.mrb[90].mxu0 }
 0x23f   :  { %v3425_v42 = vpop.f32.mrb[91].mxu0 }
 0x240   :  { %v3492_v51 = vpop.f32.mrb[88].mxu1 }
 0x241   :  { %v3649_v23 = vadd.f32 %v3492_v51, %v3193_v21  ;;  %v3494_v24 = vpop.f32.mrb[89].mxu1 }
 0x242   :  { %v3650_v50 = vadd.f32 %v3494_v24, %v3194_v0  ;;  %v3496_v20 = vpop.f32.mrb[90].mxu1 }
 0x243   :  { %v3497_v45 = vpop.f32.mrb[91].mxu1 }
 0x248   :  { %v3564_v58 = vpop.f32.mrb[92].mxu0 }
 0x249   :  { %v5470_v34 = vadd.f32 %v3564_v58, %v3195_v55  ;;  %v3566_v25 = vpop.f32.mrb[93].mxu0 }
 0x24a   :  { %v5472_v41 = vadd.f32 %v3566_v25, %v3196_v56  ;;  %v3568_v60 = vpop.f32.mrb[94].mxu0 }
 0x24b   :  { %v3569_v30 = vpop.f32.mrb[95].mxu0 }
 0x24c   :  { %v3636_v35 = vpop.f32.mrb[92].mxu1 }
 0x24d   :  { %v5474_v26 = vadd.f32 %v3636_v35, %v3197_v61  ;;  %v3638_v9 = vpop.f32.mrb[93].mxu1 }
 0x24e   :  { %v5476_v38 = vadd.f32 %v3638_v9, %v3198_v1  ;;  %v3640_v11 = vpop.f32.mrb[94].mxu1 }
 0x24f   :  { %v3641_v44 = vpop.f32.mrb[95].mxu1 }
 0x254   :  { %v3732_v17 = vpop.f32.mrb[96].mxu0 }
 0x255   :  { %v4099_v29 = vsel %vm5284_vm12, %v3732_v17, 0.0  ;;  %v3734_v39 = vpop.f32.mrb[97].mxu0 }
 0x256   :  { %v4111_v46 = vadd.f32 %v4099_v29, %v3643_v2  ;;  %v4100_v21 = vsel %vm5291_vm13, %v3734_v39, 0.0  ;;  %v3736_v57 = vpop.f32.mrb[98].mxu0 }
 0x257   :  { %v4112_v32 = vadd.f32 %v4100_v21, %v3644_v6  ;;  %v3737_v0 = vpop.f32.mrb[99].mxu0 }
 0x258   :  { %v4129_v27 = vadd.f32 %v5480_v7, %v4111_v46  ;;  %v3804_v48 = vpop.f32.mrb[96].mxu1 }
 0x259   :  { %v4130_v22 = vadd.f32 %v5480_v7, %v4112_v32  ;;  %v4101_v53 = vsel %vm5284_vm12, %v3804_v48, 0.0  ;;  %v3806_v55 = vpop.f32.mrb[97].mxu1 }
 0x25a   :  { %4141 = vst [vmem:[#allocation2] sm:$0xff] %v4129_v27  ;;  %v4113_v28 = vadd.f32 %v4101_v53, %v3645_v47  ;;  %v4102_v43 = vsel %vm5291_vm13, %v3806_v55, 0.0  ;;  %v3808_v56 = vpop.f32.mrb[98].mxu1 }
 0x25b   :  { %4142 = vst [vmem:[#allocation2 + $0x8] sm:$0xff] %v4130_v22  ;;  %v4114_v4 = vadd.f32 %v4102_v43, %v3646_v19  ;;  %v3809_v3 = vpop.f32.mrb[99].mxu1 }
 0x25c   :  { %v4131_v37 = vadd.f32 %v5480_v7, %v4113_v28 }
 0x25d   :  { %v4132_v10 = vadd.f32 %v5480_v7, %v4114_v4 }
 0x25e   :  { %4143 = vst [vmem:[#allocation2 + $0x10] sm:$0xff] %v4131_v37 }
 0x25f   :  { %4144 = vst [vmem:[#allocation2 + $0x18] sm:$0xff] %v4132_v10 }
 0x260   :  { %v3876_v61 = vpop.f32.mrb[100].mxu0 }
 0x261   :  { %v4103_v63 = vsel %vm5284_vm12, %v3876_v61, 0.0  ;;  %v3878_v40 = vpop.f32.mrb[101].mxu0 }
 0x262   :  { %v4115_v1 = vadd.f32 %v4103_v63, %v3647_v54  ;;  %v4104_v14 = vsel %vm5291_vm13, %v3878_v40, 0.0  ;;  %v3880_v59 = vpop.f32.mrb[102].mxu0 }
 0x263   :  { %v4116_v2 = vadd.f32 %v4104_v14, %v3648_v52  ;;  %v3881_v5 = vpop.f32.mrb[103].mxu0 }
 0x264   :  { %v4133_v6 = vadd.f32 %v5480_v7, %v4115_v1  ;;  %v3948_v8 = vpop.f32.mrb[100].mxu1 }
 0x265   :  { %v4134_v62 = vadd.f32 %v5480_v7, %v4116_v2  ;;  %v4105_v15 = vsel %vm5284_vm12, %v3948_v8, 0.0  ;;  %v3950_v47 = vpop.f32.mrb[101].mxu1 }
 0x266   :  { %4145 = vst [vmem:[#allocation2 + $0x20] sm:$0xff] %v4133_v6  ;;  %v4117_v13 = vadd.f32 %v4105_v15, %v3649_v23  ;;  %v4106_v19 = vsel %vm5291_vm13, %v3950_v47, 0.0  ;;  %v3952_v49 = vpop.f32.mrb[102].mxu1 }
 0x267   :  { %4146 = vst [vmem:[#allocation2 + $0x28] sm:$0xff] %v4134_v62  ;;  %v4118_v12 = vadd.f32 %v4106_v19, %v3650_v50  ;;  %v3953_v16 = vpop.f32.mrb[103].mxu1 }
 0x268   :  { %v4135_v54 = vadd.f32 %v5480_v7, %v4117_v13 }
 0x269   :  { %v4136_v18 = vadd.f32 %v5480_v7, %v4118_v12 }
 0x26a   :  { %4147 = vst [vmem:[#allocation2 + $0x30] sm:$0xff] %v4135_v54 }
 0x26b   :  { %4148 = vst [vmem:[#allocation2 + $0x38] sm:$0xff] %v4136_v18 }
 0x26c   :  { %v4020_v52 = vpop.f32.mrb[104].mxu0 }
 0x26d   :  { %v4107_v31 = vsel %vm5284_vm12, %v4020_v52, 0.0  ;;  %v4022_v42 = vpop.f32.mrb[105].mxu0 }
 0x26e   :  { %v4119_v51 = vadd.f32 %v4107_v31, %v5470_v34  ;;  %v4108_v23 = vsel %vm5291_vm13, %v4022_v42, 0.0  ;;  %v4024_v24 = vpop.f32.mrb[106].mxu0 }
 0x26f   :  { %v4120_v50 = vadd.f32 %v4108_v23, %v5472_v41  ;;  %v4025_v20 = vpop.f32.mrb[107].mxu0 }
 0x270   :  { %v4137_v45 = vadd.f32 %v5480_v7, %v4119_v51  ;;  %v4092_v58 = vpop.f32.mrb[104].mxu1 }
 0x271   :  { %v4138_v25 = vadd.f32 %v5480_v7, %v4120_v50  ;;  %v4109_v60 = vsel %vm5284_vm12, %v4092_v58, 0.0  ;;  %v4094_v30 = vpop.f32.mrb[105].mxu1 }
 0x272   :  { %4149 = vst [vmem:[#allocation2 + $0x40] sm:$0xff] %v4137_v45  ;;  %v4121_v35 = vadd.f32 %v4109_v60, %v5474_v26  ;;  %v4110_v34 = vsel %vm5291_vm13, %v4094_v30, 0.0  ;;  %v4096_v9 = vpop.f32.mrb[106].mxu1 }
 0x273   :  { %4150 = vst [vmem:[#allocation2 + $0x48] sm:$0xff] %v4138_v25  ;;  %v4122_v41 = vadd.f32 %v4110_v34, %v5476_v38  ;;  %v4097_v11 = vpop.f32.mrb[107].mxu1 }
 0x274   :  { %v4139_v44 = vadd.f32 %v5480_v7, %v4121_v35 }
 0x275   :  { %v4140_v17 = vadd.f32 %v5480_v7, %v4122_v41 }
 0x276   :  { %4151 = vst [vmem:[#allocation2 + $0x50] sm:$0xff] %v4139_v44 }
 0x277   :  { %4152 = vst [vmem:[#allocation2 + $0x58] sm:$0xff] %v4140_v17 }
 0x278   :  { %4364 = shalt.err (!%p4361_p4)
}
 0x279   :  { %s4365_s15 = scalar_lea.hbm %s5535_s3, 1536 }
 0x27a   :  { %p4366_p5 = scmp.ne.s32.totalorder %s5535_s3, %s4365_s15  ;;  %p4369_p6 = scmp.lt.u32.totalorder %s4365_s15, %s5535_s3 }
 0x27c   :  { %p4371_p7 = pnand %p4369_p6, %p4366_p5 }
 0x27e   :  { %4374 = shalt.err (!%p4371_p7)
}
 0x27f   :  { %s4388_s20 = smov 256   ;;  %s4389_s21 = smov 16  }
 0x280   :  { %4164 = dma.vmem_to_hbm [thread:$0]  %s4159_s11, 1536, %s5535_s3, [#allocation3], %s4388_s20, %s4388_s20, %s4389_s21  }
 0x281   :  { %4375 = dma.done.wait [#allocation3], 1536  }
 0x282   :  { %4376 = vsyncadd [#allocation3], 4294965760 }
 0x283   :  { %4168 = vsyncpa [#allocation3], 1 }

</bundles_post_ra>
